<compile_context>
chip_gen: v7x
topology: tpu7x:2x2x1
jax: 0.10.0
libtpu: 0.0.40
codegen_flags: <defaults>
</compile_context>

<pallas_src>
import functools

import jax
import jax.numpy as jnp
from jax.experimental import pallas as pl
from jax.experimental.pallas import tpu as pltpu


def _ceil_to(x, m):
    return -(-x // m) * m


# ----------------------------- Pallas kernels -----------------------------

def _conv_pool_relu_kernel(p_ref, w_ref, b_ref, o_ref):
    # p_ref: (4, K, TQ) pool-offset patch planes; w_ref: (Cout, K); b_ref: (Cout, 1) f32;
    # o_ref: (Cout, TQ).  conv3x3(pad=1) + 2x2 maxpool + bias + ReLU, pool-first (exact for
    # per-channel bias; ReLU commutes with max).
    w = w_ref[...]
    y0 = jnp.dot(w, p_ref[0], preferred_element_type=jnp.float32)
    y1 = jnp.dot(w, p_ref[1], preferred_element_type=jnp.float32)
    y2 = jnp.dot(w, p_ref[2], preferred_element_type=jnp.float32)
    y3 = jnp.dot(w, p_ref[3], preferred_element_type=jnp.float32)
    pooled = jnp.maximum(jnp.maximum(y0, y1), jnp.maximum(y2, y3))          # (Cout, TQ)
    o_ref[...] = jnp.maximum(pooled + b_ref[...], 0.0).astype(o_ref.dtype)  # bias+ReLU on Q cols


def _conv_pool_fc_kernel(p_ref, w3_ref, b3_ref, fw1_ref, fb1_ref, fw2_ref, fb2_ref,
                         o_ref, *, per):
    # conv3 (+pool+bias+ReLU) + flatten + fc1 + ReLU + fc2, all VMEM-resident.
    # p_ref: (4, K3, TN*per); w3_ref: (Cout3, K3); fw1_ref: (Cout3*per, 512); o_ref: (TN, classes).
    w3 = w3_ref[...]
    y0 = jnp.dot(w3, p_ref[0], preferred_element_type=jnp.float32)
    y1 = jnp.dot(w3, p_ref[1], preferred_element_type=jnp.float32)
    y2 = jnp.dot(w3, p_ref[2], preferred_element_type=jnp.float32)
    y3 = jnp.dot(w3, p_ref[3], preferred_element_type=jnp.float32)
    pooled = jnp.maximum(jnp.maximum(y0, y1), jnp.maximum(y2, y3))          # (Cout3, TN*per)
    act = jnp.maximum(pooled + b3_ref[...], 0.0)                            # f32 epilogue

    cout = act.shape[0]
    assert act.shape[1] % per == 0
    tn = act.shape[1] // per
    # PyTorch flatten order (c, h, w): act columns are (n, h, w)-ordered, so a single tiny
    # reshape/transpose/reshape yields the (TN, Cout*per) fc1 input; no per-channel slicing.
    x = act.reshape(cout, tn, per)
    x = jnp.transpose(x, (1, 0, 2))                                         # (TN, Cout, per)
    x = x.reshape(tn, cout * per)
    # NOTE: the extra ReLU after flatten in the PyTorch forward is a no-op here (act >= 0).

    h = jnp.dot(x.astype(fw1_ref.dtype), fw1_ref[...],
                preferred_element_type=jnp.float32) + fb1_ref[...]          # fc1
    h = jnp.maximum(h, 0.0)                                                 # relu
    out = jnp.dot(h.astype(fw2_ref.dtype), fw2_ref[...],
                  preferred_element_type=jnp.float32) + fb2_ref[...]        # fc2
    o_ref[...] = out.astype(o_ref.dtype)


# --------------------------- XLA glue (tiny tensors) ---------------------------

def im2col_pool_planes(a, dtype, k_pad):
    """a: (C, N, H, W) -> pool-offset patch planes (4, k_pad, Q), Q = N*(H//2)*(W//2).

    Plane p = 2*py + px holds, for pooled position (n, ho, wo), the 3x3/pad-1 patch (rows
    ordered (kh, kw, cin), zero-padded to k_pad rows) centred on conv position
    (2*ho+py, 2*wo+px).  conv + 2x2 maxpool then = max_p (W @ plane_p), computed in-kernel.
    Built from strided slices only (no big stack+7D-transpose); cast to `dtype` up front.
    """
    C, N, H, W = a.shape
    Hh, Wh = H // 2, W // 2
    Q = N * Hh * Wh
    K = 9 * C
    ap = jnp.pad(a.astype(dtype), ((0, 0), (0, 0), (1, 1), (1, 1)))          # (C, N, H+2, W+2)
    planes = []
    for py in range(2):
        for px in range(2):
            rows = [
                jax.lax.slice(ap,
                              (0, 0, py + kh, px + kw),
                              (C, N, py + kh + H - 1, px + kw + W - 1),
                              (1, 1, 2, 2)).reshape(C, Q)                    # cols (n, ho, wo)
                for kh in range(3) for kw in range(3)]
            plane = jnp.concatenate(rows, axis=0)                            # (9C, Q), rows (kh,kw,c)
            if k_pad > K:
                plane = jnp.concatenate([plane, jnp.zeros((k_pad - K, Q), dtype)], axis=0)
            planes.append(plane)
    return jnp.stack(planes, axis=0)                                         # (4, k_pad, Q)


def conv_weight_mat(w_oihw, dtype, k_pad):
    """OIHW -> (Cout, k_pad); columns ordered (kh, kw, cin), zero-padded to k_pad."""
    O, I = w_oihw.shape[0], w_oihw.shape[1]
    K = 9 * I
    wm = jnp.transpose(w_oihw, (2, 3, 1, 0)).reshape(K, O).T                 # (O, 9I)
    if k_pad > K:
        wm = jnp.pad(wm, ((0, 0), (0, k_pad - K)))
    return wm.astype(dtype)


# ----------------------------- layer wrappers -----------------------------

def conv_pool_relu(planes, wmat, bias, *, tq_max=8192):
    """conv3x3(pad=1) + bias + ReLU + maxpool2x2.  planes: (4, K, Q) -> (Cout, Q) f32.

    1-D 'parallel' grid over Q tiles.  tq_max=8192 is v7x-safe (64 MiB VMEM, 2 TCs); on
    v6e/v5e (128 MiB) it can be raised 2-4x for fewer grid steps.
    """
    cout, k = wmat.shape
    q = planes.shape[2]
    assert planes.shape[1] == k
    tq = q if q <= tq_max else tq_max
    assert q % tq == 0 and (tq == q or tq % 128 == 0), (q, tq)
    return pl.pallas_call(
        _conv_pool_relu_kernel,
        out_shape=jax.ShapeDtypeStruct((cout, q), jnp.float32),
        grid_spec=pltpu.PrefetchScalarGridSpec(
            num_scalar_prefetch=0,
            grid=(q // tq,),
            in_specs=[pl.BlockSpec((4, k, tq), lambda i: (0, 0, i)),
                      pl.BlockSpec((cout, k), lambda i: (0, 0)),
                      pl.BlockSpec((cout, 1), lambda i: (0, 0))],
            out_specs=pl.BlockSpec((cout, tq), lambda i: (0, i))),
        compiler_params=pltpu.CompilerParams(dimension_semantics=("parallel",)),
    )(planes, wmat, bias.astype(jnp.float32).reshape(cout, 1))


def conv_pool_fc(planes, w3mat, b3, fw1, fb1, fw2, fb2, *, n_batch, per, tn_max=128):
    """Fused conv3 + pool + flatten + ReLU + fc1 + ReLU + fc2 -> (n_batch, num_classes) f32."""
    cout, k = w3mat.shape
    q = planes.shape[2]
    assert q == n_batch * per, (q, n_batch, per)
    assert fw1.shape[0] == cout * per
    num_classes = fw2.shape[1]
    tn = n_batch if n_batch <= tn_max else tn_max
    assert n_batch % tn == 0 and (tn == n_batch or tn % 8 == 0), (n_batch, tn)
    kern = functools.partial(_conv_pool_fc_kernel, per=per)
    return pl.pallas_call(
        kern,
        out_shape=jax.ShapeDtypeStruct((n_batch, num_classes), jnp.float32),
        grid_spec=pltpu.PrefetchScalarGridSpec(
            num_scalar_prefetch=0,
            grid=(n_batch // tn,),
            in_specs=[pl.BlockSpec((4, k, tn * per), lambda i: (0, 0, i)),
                      pl.BlockSpec((cout, k), lambda i: (0, 0)),
                      pl.BlockSpec((cout, 1), lambda i: (0, 0)),
                      pl.BlockSpec(fw1.shape, lambda i: (0, 0)),
                      pl.BlockSpec((1, fw1.shape[1]), lambda i: (0, 0)),
                      pl.BlockSpec(fw2.shape, lambda i: (0, 0)),
                      pl.BlockSpec((1, num_classes), lambda i: (0, 0))],
            out_specs=pl.BlockSpec((tn, num_classes), lambda i: (i, 0))),
        compiler_params=pltpu.CompilerParams(dimension_semantics=("parallel",)),
    )(planes, w3mat, b3.astype(jnp.float32).reshape(cout, 1),
      fw1, fb1.astype(jnp.float32).reshape(1, -1),
      fw2, fb2.astype(jnp.float32).reshape(1, -1))


# ------------------------------ full forward ------------------------------

def cnn_forward(params, x_nchw, *, compute_dtype=jnp.float32):
    """Forward pass matching the PyTorch CNN.

    compute_dtype controls MXU input precision only (patch matrices + weights); inter-layer
    activations, accumulation and all epilogues stay f32.  bf16 is valid on v5e/v6e/v7x MXUs,
    but is not exercised by this script (interpret/CPU dot executor lacks bf16 support).
    """
    N, _, H, W = x_nchw.shape
    cd = compute_dtype

    def stage(act_cnhw, w_oihw):
        kp = _ceil_to(9 * w_oihw.shape[1], 8)        # pad contraction rows to sublane multiple
        return (im2col_pool_planes(act_cnhw, cd, kp),
                conv_weight_mat(w_oihw, cd, kp))

    a = jnp.transpose(x_nchw, (1, 0, 2, 3))          # NCHW -> (C, N, H, W)

    p1, w1m = stage(a, params["w1"])
    act1 = conv_pool_relu(p1, w1m, params["b1"])     # (oc,  N*(H/2)*(W/2))
    h1, w1 = H // 2, W // 2

    p2, w2m = stage(act1.reshape(act1.shape[0], N, h1, w1), params["w2"])
    act2 = conv_pool_relu(p2, w2m, params["b2"])     # (2oc, N*(H/4)*(W/4))
    h2, w2 = h1 // 2, w1 // 2

    p3, w3m = stage(act2.reshape(act2.shape[0], N, h2, w2), params["w3"])
    per = (h2 // 2) * (w2 // 2)                      # pooled spatial positions per sample
    out = conv_pool_fc(p3, w3m, params["b3"],
                       params["fw1"].astype(cd), params["fb1"],
                       params["fw2"].astype(cd), params["fb2"],
                       n_batch=N, per=per)
    return out


# ------------------------------ params / ref ------------------------------

def init_params(key, input_channel, output_channel, num_classes):
    ks = jax.random.split(key, 10)
    oc = output_channel
    fc1_in = oc * 4 * 4 * 4
    return {
        "w1": 0.1 * jax.random.normal(ks[0], (oc, input_channel, 3, 3), jnp.float32),
        "b1": 0.1 * jax.random.normal(ks[1], (oc,), jnp.float32),
        "w2": 0.1 * jax.random.normal(ks[2], (oc * 2, oc, 3, 3), jnp.float32),
        "b2": 0.1 * jax.random.normal(ks[3], (oc * 2,), jnp.float32),
        "w3": 0.1 * jax.random.normal(ks[4], (oc * 4, oc * 2, 3, 3), jnp.float32),
        "b3": 0.1 * jax.random.normal(ks[5], (oc * 4,), jnp.float32),
        "fw1": 0.05 * jax.random.normal(ks[6], (fc1_in, 512), jnp.float32),
        "fb1": 0.05 * jax.random.normal(ks[7], (512,), jnp.float32),
        "fw2": 0.05 * jax.random.normal(ks[8], (512, num_classes), jnp.float32),
        "fb2": 0.05 * jax.random.normal(ks[9], (num_classes,), jnp.float32),
    }


def reference_forward(params, x_nchw):
    """Pure-JAX reference mirroring the PyTorch module (correctness check only)."""
    def conv(x, w, b):
        y = jax.lax.conv_general_dilated(
            x, w, window_strides=(1, 1), padding=((1, 1), (1, 1)),
            dimension_numbers=("NCHW", "OIHW", "NCHW"))
        return y + b[None, :, None, None]

    def pool(x):
        return jax.lax.reduce_window(x, -jnp.inf, jax.lax.max,
                                     (1, 1, 2, 2), (1, 1, 2, 2), "VALID")

    x = pool(jnp.maximum(conv(x_nchw, params["w1"], params["b1"]), 0.0))
    x = pool(jnp.maximum(conv(x, params["w2"], params["b2"]), 0.0))
    x = pool(jnp.maximum(conv(x, params["w3"], params["b3"]), 0.0))
    x = x.reshape(x.shape[0], -1)
    x = jnp.maximum(x, 0.0)
    x = jnp.maximum(x @ params["fw1"] + params["fb1"], 0.0)
    x = x @ params["fw2"] + params["fb2"]
    return x


# ----------------------------------- main ----------------------------------

if __name__ == "__main__":
    key = jax.random.PRNGKey(0)
    input_channel, output_channel, num_classes = 3, 4, 10
    params = init_params(key, input_channel, output_channel, num_classes)

    # fc1 expects output_channel*4 * 4 * 4 features -> spatial input must be 32x32
    x = jax.random.normal(jax.random.fold_in(key, 123),
                          (2, input_channel, 32, 32), jnp.float32)

    ref = reference_forward(params, x)

    out = jax.jit(cnn_forward)(params, x)      # f32 path (default compute_dtype)
    jax.block_until_ready(out)
    assert out.shape == (2, num_classes), out.shape
    assert jnp.allclose(out, ref, rtol=1e-4, atol=1e-4), float(jnp.abs(out - ref).max())

    print("KERNEL_OK")
</pallas_src>

<mosaic_0001>
module attributes {stable_mosaic.version = 11 : i64} {
  func.func @_conv_pool_relu_kernel(%arg0: i32, %arg1: memref<4x32x512xf32, #tpu.memory_space<vmem>>, %arg2: memref<4x32xf32, #tpu.memory_space<vmem>>, %arg3: memref<4x1xf32, #tpu.memory_space<vmem>>, %arg4: memref<4x512xf32, #tpu.memory_space<vmem>>) attributes {dimension_semantics = [#tpu.dimension_semantics<parallel>], iteration_bounds = array<i64: 1>, scalar_prefetch = 0 : i64, scratch_operands = 0 : i64, tpu.core_type = #tpu.core_type<tc>, window_params = [{transform_indices = @transform_0, window_bounds = array<i64: 4, 32, 512>}, {pipeline_mode = #tpu.pipeline_mode<synchronous>, transform_indices = @transform_1, window_bounds = array<i64: 4, 32>}, {pipeline_mode = #tpu.pipeline_mode<synchronous>, transform_indices = @transform_2, window_bounds = array<i64: 4, 1>}, {transform_indices = @transform_3, window_bounds = array<i64: 4, 512>}]} {
    %c0 = arith.constant 0 : index
    %c0_0 = arith.constant 0 : index
    %0 = vector.load %arg2[%c0, %c0_0] : memref<4x32xf32, #tpu.memory_space<vmem>>, vector<4x32xf32>
    %c0_1 = arith.constant 0 : index
    %c0_2 = arith.constant 0 : index
    %c0_3 = arith.constant 0 : index
    %1 = vector.load %arg1[%c0_1, %c0_2, %c0_3] : memref<4x32x512xf32, #tpu.memory_space<vmem>>, vector<1x32x512xf32>
    %2 = vector.shape_cast %1 : vector<1x32x512xf32> to vector<32x512xf32>
    %cst = arith.constant dense<0.000000e+00> : vector<4x512xf32>
    %3 = tpu.matmul %0, %2, %cst {dimension_numbers = #tpu.dot_dimension_numbers<[1], [0], [0], [1], [0, 0, 1, 1], [], []>} : vector<4x32xf32>, vector<32x512xf32>, vector<4x512xf32> -> vector<4x512xf32>
    %c1 = arith.constant 1 : index
    %c0_4 = arith.constant 0 : index
    %c0_5 = arith.constant 0 : index
    %4 = vector.load %arg1[%c1, %c0_4, %c0_5] : memref<4x32x512xf32, #tpu.memory_space<vmem>>, vector<1x32x512xf32>
    %5 = vector.shape_cast %4 : vector<1x32x512xf32> to vector<32x512xf32>
    %cst_6 = arith.constant dense<0.000000e+00> : vector<4x512xf32>
    %6 = tpu.matmul %0, %5, %cst_6 {dimension_numbers = #tpu.dot_dimension_numbers<[1], [0], [0], [1], [0, 0, 1, 1], [], []>} : vector<4x32xf32>, vector<32x512xf32>, vector<4x512xf32> -> vector<4x512xf32>
    %c2 = arith.constant 2 : index
    %c0_7 = arith.constant 0 : index
    %c0_8 = arith.constant 0 : index
    %7 = vector.load %arg1[%c2, %c0_7, %c0_8] : memref<4x32x512xf32, #tpu.memory_space<vmem>>, vector<1x32x512xf32>
    %8 = vector.shape_cast %7 : vector<1x32x512xf32> to vector<32x512xf32>
    %cst_9 = arith.constant dense<0.000000e+00> : vector<4x512xf32>
    %9 = tpu.matmul %0, %8, %cst_9 {dimension_numbers = #tpu.dot_dimension_numbers<[1], [0], [0], [1], [0, 0, 1, 1], [], []>} : vector<4x32xf32>, vector<32x512xf32>, vector<4x512xf32> -> vector<4x512xf32>
    %c3 = arith.constant 3 : index
    %c0_10 = arith.constant 0 : index
    %c0_11 = arith.constant 0 : index
    %10 = vector.load %arg1[%c3, %c0_10, %c0_11] : memref<4x32x512xf32, #tpu.memory_space<vmem>>, vector<1x32x512xf32>
    %11 = vector.shape_cast %10 : vector<1x32x512xf32> to vector<32x512xf32>
    %cst_12 = arith.constant dense<0.000000e+00> : vector<4x512xf32>
    %12 = tpu.matmul %0, %11, %cst_12 {dimension_numbers = #tpu.dot_dimension_numbers<[1], [0], [0], [1], [0, 0, 1, 1], [], []>} : vector<4x32xf32>, vector<32x512xf32>, vector<4x512xf32> -> vector<4x512xf32>
    %13 = arith.maximumf %3, %6 : vector<4x512xf32>
    %14 = arith.maximumf %9, %12 : vector<4x512xf32>
    %15 = arith.maximumf %13, %14 : vector<4x512xf32>
    %c0_13 = arith.constant 0 : index
    %c0_14 = arith.constant 0 : index
    %16 = vector.load %arg3[%c0_13, %c0_14] : memref<4x1xf32, #tpu.memory_space<vmem>>, vector<4x1xf32>
    %17 = vector.broadcast %16 : vector<4x1xf32> to vector<4x512xf32>
    %18 = arith.addf %15, %17 : vector<4x512xf32>
    %cst_15 = arith.constant 0.000000e+00 : f32
    %19 = vector.broadcast %cst_15 : f32 to vector<4x512xf32>
    %20 = arith.maximumf %18, %19 : vector<4x512xf32>
    %c0_16 = arith.constant 0 : index
    %c0_17 = arith.constant 0 : index
    %21 = vector.load %arg4[%c0_16, %c0_17] : memref<4x512xf32, #tpu.memory_space<vmem>>, vector<4x512xf32>
    tpu.vector_store %arg4[%c0_16, %c0_17], %20 {strides = array<i32>} : memref<4x512xf32, #tpu.memory_space<vmem>>, vector<4x512xf32>,
    return
  }
  func.func @transform_0(%arg0: i32) -> (i32, i32, i32) {
    %c0_i32 = arith.constant 0 : i32
    %c0_i32_0 = arith.constant 0 : i32
    %c0_i32_1 = arith.constant 0 : i32
    return %c0_i32, %c0_i32_0, %arg0 : i32, i32, i32
  }
  func.func @transform_1(%arg0: i32) -> (i32, i32) {
    %c0_i32 = arith.constant 0 : i32
    %c0_i32_0 = arith.constant 0 : i32
    %c0_i32_1 = arith.constant 0 : i32
    return %c0_i32, %c0_i32_0 : i32, i32
  }
  func.func @transform_2(%arg0: i32) -> (i32, i32) {
    %c0_i32 = arith.constant 0 : i32
    %c0_i32_0 = arith.constant 0 : i32
    %c0_i32_1 = arith.constant 0 : i32
    return %c0_i32, %c0_i32_0 : i32, i32
  }
  func.func @transform_3(%arg0: i32) -> (i32, i32) {
    %c0_i32 = arith.constant 0 : i32
    %c0_i32_0 = arith.constant 0 : i32
    return %c0_i32, %arg0 : i32, i32
  }
}

module attributes {stable_mosaic.version = 11 : i64} {
  func.func @_conv_pool_relu_kernel(%arg0: i32, %arg1: memref<4x40x128xf32, #tpu.memory_space<vmem>>, %arg2: memref<8x40xf32, #tpu.memory_space<vmem>>, %arg3: memref<8x1xf32, #tpu.memory_space<vmem>>, %arg4: memref<8x128xf32, #tpu.memory_space<vmem>>) attributes {dimension_semantics = [#tpu.dimension_semantics<parallel>], iteration_bounds = array<i64: 1>, scalar_prefetch = 0 : i64, scratch_operands = 0 : i64, tpu.core_type = #tpu.core_type<tc>, window_params = [{transform_indices = @transform_0, window_bounds = array<i64: 4, 40, 128>}, {pipeline_mode = #tpu.pipeline_mode<synchronous>, transform_indices = @transform_1, window_bounds = array<i64: 8, 40>}, {pipeline_mode = #tpu.pipeline_mode<synchronous>, transform_indices = @transform_2, window_bounds = array<i64: 8, 1>}, {transform_indices = @transform_3, window_bounds = array<i64: 8, 128>}]} {
    %c0 = arith.constant 0 : index
    %c0_0 = arith.constant 0 : index
    %0 = vector.load %arg2[%c0, %c0_0] : memref<8x40xf32, #tpu.memory_space<vmem>>, vector<8x40xf32>
    %c0_1 = arith.constant 0 : index
    %c0_2 = arith.constant 0 : index
    %c0_3 = arith.constant 0 : index
    %1 = vector.load %arg1[%c0_1, %c0_2, %c0_3] : memref<4x40x128xf32, #tpu.memory_space<vmem>>, vector<1x40x128xf32>
    %2 = vector.shape_cast %1 : vector<1x40x128xf32> to vector<40x128xf32>
    %cst = arith.constant dense<0.000000e+00> : vector<8x128xf32>
    %3 = tpu.matmul %0, %2, %cst {dimension_numbers = #tpu.dot_dimension_numbers<[1], [0], [0], [1], [0, 0, 1, 1], [], []>} : vector<8x40xf32>, vector<40x128xf32>, vector<8x128xf32> -> vector<8x128xf32>
    %c1 = arith.constant 1 : index
    %c0_4 = arith.constant 0 : index
    %c0_5 = arith.constant 0 : index
    %4 = vector.load %arg1[%c1, %c0_4, %c0_5] : memref<4x40x128xf32, #tpu.memory_space<vmem>>, vector<1x40x128xf32>
    %5 = vector.shape_cast %4 : vector<1x40x128xf32> to vector<40x128xf32>
    %cst_6 = arith.constant dense<0.000000e+00> : vector<8x128xf32>
    %6 = tpu.matmul %0, %5, %cst_6 {dimension_numbers = #tpu.dot_dimension_numbers<[1], [0], [0], [1], [0, 0, 1, 1], [], []>} : vector<8x40xf32>, vector<40x128xf32>, vector<8x128xf32> -> vector<8x128xf32>
    %c2 = arith.constant 2 : index
    %c0_7 = arith.constant 0 : index
    %c0_8 = arith.constant 0 : index
    %7 = vector.load %arg1[%c2, %c0_7, %c0_8] : memref<4x40x128xf32, #tpu.memory_space<vmem>>, vector<1x40x128xf32>
    %8 = vector.shape_cast %7 : vector<1x40x128xf32> to vector<40x128xf32>
    %cst_9 = arith.constant dense<0.000000e+00> : vector<8x128xf32>
    %9 = tpu.matmul %0, %8, %cst_9 {dimension_numbers = #tpu.dot_dimension_numbers<[1], [0], [0], [1], [0, 0, 1, 1], [], []>} : vector<8x40xf32>, vector<40x128xf32>, vector<8x128xf32> -> vector<8x128xf32>
    %c3 = arith.constant 3 : index
    %c0_10 = arith.constant 0 : index
    %c0_11 = arith.constant 0 : index
    %10 = vector.load %arg1[%c3, %c0_10, %c0_11] : memref<4x40x128xf32, #tpu.memory_space<vmem>>, vector<1x40x128xf32>
    %11 = vector.shape_cast %10 : vector<1x40x128xf32> to vector<40x128xf32>
    %cst_12 = arith.constant dense<0.000000e+00> : vector<8x128xf32>
    %12 = tpu.matmul %0, %11, %cst_12 {dimension_numbers = #tpu.dot_dimension_numbers<[1], [0], [0], [1], [0, 0, 1, 1], [], []>} : vector<8x40xf32>, vector<40x128xf32>, vector<8x128xf32> -> vector<8x128xf32>
    %13 = arith.maximumf %3, %6 : vector<8x128xf32>
    %14 = arith.maximumf %9, %12 : vector<8x128xf32>
    %15 = arith.maximumf %13, %14 : vector<8x128xf32>
    %c0_13 = arith.constant 0 : index
    %c0_14 = arith.constant 0 : index
    %16 = vector.load %arg3[%c0_13, %c0_14] : memref<8x1xf32, #tpu.memory_space<vmem>>, vector<8x1xf32>
    %17 = vector.broadcast %16 : vector<8x1xf32> to vector<8x128xf32>
    %18 = arith.addf %15, %17 : vector<8x128xf32>
    %cst_15 = arith.constant 0.000000e+00 : f32
    %19 = vector.broadcast %cst_15 : f32 to vector<8x128xf32>
    %20 = arith.maximumf %18, %19 : vector<8x128xf32>
    %c0_16 = arith.constant 0 : index
    %c0_17 = arith.constant 0 : index
    %21 = vector.load %arg4[%c0_16, %c0_17] : memref<8x128xf32, #tpu.memory_space<vmem>>, vector<8x128xf32>
    tpu.vector_store %arg4[%c0_16, %c0_17], %20 {strides = array<i32>} : memref<8x128xf32, #tpu.memory_space<vmem>>, vector<8x128xf32>,
    return
  }
  func.func @transform_0(%arg0: i32) -> (i32, i32, i32) {
    %c0_i32 = arith.constant 0 : i32
    %c0_i32_0 = arith.constant 0 : i32
    %c0_i32_1 = arith.constant 0 : i32
    return %c0_i32, %c0_i32_0, %arg0 : i32, i32, i32
  }
  func.func @transform_1(%arg0: i32) -> (i32, i32) {
    %c0_i32 = arith.constant 0 : i32
    %c0_i32_0 = arith.constant 0 : i32
    %c0_i32_1 = arith.constant 0 : i32
    return %c0_i32, %c0_i32_0 : i32, i32
  }
  func.func @transform_2(%arg0: i32) -> (i32, i32) {
    %c0_i32 = arith.constant 0 : i32
    %c0_i32_0 = arith.constant 0 : i32
    %c0_i32_1 = arith.constant 0 : i32
    return %c0_i32, %c0_i32_0 : i32, i32
  }
  func.func @transform_3(%arg0: i32) -> (i32, i32) {
    %c0_i32 = arith.constant 0 : i32
    %c0_i32_0 = arith.constant 0 : i32
    return %c0_i32, %arg0 : i32, i32
  }
}

module attributes {stable_mosaic.version = 11 : i64} {
  func.func @_conv_pool_fc_kernel(%arg0: i32, %arg1: memref<4x72x32xf32, #tpu.memory_space<vmem>>, %arg2: memref<16x72xf32, #tpu.memory_space<vmem>>, %arg3: memref<16x1xf32, #tpu.memory_space<vmem>>, %arg4: memref<256x512xf32, #tpu.memory_space<vmem>>, %arg5: memref<1x512xf32, #tpu.memory_space<vmem>>, %arg6: memref<512x10xf32, #tpu.memory_space<vmem>>, %arg7: memref<1x10xf32, #tpu.memory_space<vmem>>, %arg8: memref<2x10xf32, #tpu.memory_space<vmem>>) attributes {dimension_semantics = [#tpu.dimension_semantics<parallel>], iteration_bounds = array<i64: 1>, scalar_prefetch = 0 : i64, scratch_operands = 0 : i64, tpu.core_type = #tpu.core_type<tc>, window_params = [{transform_indices = @transform_0, window_bounds = array<i64: 4, 72, 32>}, {pipeline_mode = #tpu.pipeline_mode<synchronous>, transform_indices = @transform_1, window_bounds = array<i64: 16, 72>}, {pipeline_mode = #tpu.pipeline_mode<synchronous>, transform_indices = @transform_2, window_bounds = array<i64: 16, 1>}, {pipeline_mode = #tpu.pipeline_mode<synchronous>, transform_indices = @transform_3, window_bounds = array<i64: 256, 512>}, {pipeline_mode = #tpu.pipeline_mode<synchronous>, transform_indices = @transform_4, window_bounds = array<i64: 1, 512>}, {pipeline_mode = #tpu.pipeline_mode<synchronous>, transform_indices = @transform_5, window_bounds = array<i64: 512, 10>}, {pipeline_mode = #tpu.pipeline_mode<synchronous>, transform_indices = @transform_6, window_bounds = array<i64: 1, 10>}, {transform_indices = @transform_7, window_bounds = array<i64: 2, 10>}]} {
    %c0 = arith.constant 0 : index
    %c0_0 = arith.constant 0 : index
    %0 = vector.load %arg2[%c0, %c0_0] : memref<16x72xf32, #tpu.memory_space<vmem>>, vector<16x72xf32>
    %c0_1 = arith.constant 0 : index
    %c0_2 = arith.constant 0 : index
    %c0_3 = arith.constant 0 : index
    %1 = vector.load %arg1[%c0_1, %c0_2, %c0_3] : memref<4x72x32xf32, #tpu.memory_space<vmem>>, vector<1x72x32xf32>
    %2 = vector.shape_cast %1 : vector<1x72x32xf32> to vector<72x32xf32>
    %cst = arith.constant dense<0.000000e+00> : vector<16x32xf32>
    %3 = tpu.matmul %0, %2, %cst {dimension_numbers = #tpu.dot_dimension_numbers<[1], [0], [0], [1], [0, 0, 1, 1], [], []>} : vector<16x72xf32>, vector<72x32xf32>, vector<16x32xf32> -> vector<16x32xf32>
    %c1 = arith.constant 1 : index
    %c0_4 = arith.constant 0 : index
    %c0_5 = arith.constant 0 : index
    %4 = vector.load %arg1[%c1, %c0_4, %c0_5] : memref<4x72x32xf32, #tpu.memory_space<vmem>>, vector<1x72x32xf32>
    %5 = vector.shape_cast %4 : vector<1x72x32xf32> to vector<72x32xf32>
    %cst_6 = arith.constant dense<0.000000e+00> : vector<16x32xf32>
    %6 = tpu.matmul %0, %5, %cst_6 {dimension_numbers = #tpu.dot_dimension_numbers<[1], [0], [0], [1], [0, 0, 1, 1], [], []>} : vector<16x72xf32>, vector<72x32xf32>, vector<16x32xf32> -> vector<16x32xf32>
    %c2 = arith.constant 2 : index
    %c0_7 = arith.constant 0 : index
    %c0_8 = arith.constant 0 : index
    %7 = vector.load %arg1[%c2, %c0_7, %c0_8] : memref<4x72x32xf32, #tpu.memory_space<vmem>>, vector<1x72x32xf32>
    %8 = vector.shape_cast %7 : vector<1x72x32xf32> to vector<72x32xf32>
    %cst_9 = arith.constant dense<0.000000e+00> : vector<16x32xf32>
    %9 = tpu.matmul %0, %8, %cst_9 {dimension_numbers = #tpu.dot_dimension_numbers<[1], [0], [0], [1], [0, 0, 1, 1], [], []>} : vector<16x72xf32>, vector<72x32xf32>, vector<16x32xf32> -> vector<16x32xf32>
    %c3 = arith.constant 3 : index
    %c0_10 = arith.constant 0 : index
    %c0_11 = arith.constant 0 : index
    %10 = vector.load %arg1[%c3, %c0_10, %c0_11] : memref<4x72x32xf32, #tpu.memory_space<vmem>>, vector<1x72x32xf32>
    %11 = vector.shape_cast %10 : vector<1x72x32xf32> to vector<72x32xf32>
    %cst_12 = arith.constant dense<0.000000e+00> : vector<16x32xf32>
    %12 = tpu.matmul %0, %11, %cst_12 {dimension_numbers = #tpu.dot_dimension_numbers<[1], [0], [0], [1], [0, 0, 1, 1], [], []>} : vector<16x72xf32>, vector<72x32xf32>, vector<16x32xf32> -> vector<16x32xf32>
    %13 = arith.maximumf %3, %6 : vector<16x32xf32>
    %14 = arith.maximumf %9, %12 : vector<16x32xf32>
    %15 = arith.maximumf %13, %14 : vector<16x32xf32>
    %c0_13 = arith.constant 0 : index
    %c0_14 = arith.constant 0 : index
    %16 = vector.load %arg3[%c0_13, %c0_14] : memref<16x1xf32, #tpu.memory_space<vmem>>, vector<16x1xf32>
    %17 = vector.broadcast %16 : vector<16x1xf32> to vector<16x32xf32>
    %18 = arith.addf %15, %17 : vector<16x32xf32>
    %cst_15 = arith.constant 0.000000e+00 : f32
    %19 = vector.broadcast %cst_15 : f32 to vector<16x32xf32>
    %20 = arith.maximumf %18, %19 : vector<16x32xf32>
    %21 = vector.shape_cast %20 : vector<16x32xf32> to vector<16x2x16xf32>
    %22 = tpu.transpose %21, [1, 0, 2] : vector<16x2x16xf32> -> vector<2x16x16xf32>
    %23 = vector.shape_cast %22 : vector<2x16x16xf32> to vector<2x256xf32>
    %c0_16 = arith.constant 0 : index
    %c0_17 = arith.constant 0 : index
    %24 = vector.load %arg4[%c0_16, %c0_17] : memref<256x512xf32, #tpu.memory_space<vmem>>, vector<256x512xf32>
    %cst_18 = arith.constant dense<0.000000e+00> : vector<2x512xf32>
    %25 = tpu.matmul %23, %24, %cst_18 {dimension_numbers = #tpu.dot_dimension_numbers<[1], [0], [0], [1], [0, 0, 1, 1], [], []>} : vector<2x256xf32>, vector<256x512xf32>, vector<2x512xf32> -> vector<2x512xf32>
    %c0_19 = arith.constant 0 : index
    %c0_20 = arith.constant 0 : index
    %26 = vector.load %arg5[%c0_19, %c0_20] : memref<1x512xf32, #tpu.memory_space<vmem>>, vector<1x512xf32>
    %27 = vector.broadcast %26 : vector<1x512xf32> to vector<2x512xf32>
    %28 = arith.addf %25, %27 : vector<2x512xf32>
    %cst_21 = arith.constant 0.000000e+00 : f32
    %29 = vector.broadcast %cst_21 : f32 to vector<2x512xf32>
    %30 = arith.maximumf %28, %29 : vector<2x512xf32>
    %c0_22 = arith.constant 0 : index
    %c0_23 = arith.constant 0 : index
    %31 = vector.load %arg6[%c0_22, %c0_23] : memref<512x10xf32, #tpu.memory_space<vmem>>, vector<512x10xf32>
    %cst_24 = arith.constant dense<0.000000e+00> : vector<2x10xf32>
    %32 = tpu.matmul %30, %31, %cst_24 {dimension_numbers = #tpu.dot_dimension_numbers<[1], [0], [0], [1], [0, 0, 1, 1], [], []>} : vector<2x512xf32>, vector<512x10xf32>, vector<2x10xf32> -> vector<2x10xf32>
    %c0_25 = arith.constant 0 : index
    %c0_26 = arith.constant 0 : index
    %33 = vector.load %arg7[%c0_25, %c0_26] : memref<1x10xf32, #tpu.memory_space<vmem>>, vector<1x10xf32>
    %34 = vector.broadcast %33 : vector<1x10xf32> to vector<2x10xf32>
    %35 = arith.addf %32, %34 : vector<2x10xf32>
    %c0_27 = arith.constant 0 : index
    %c0_28 = arith.constant 0 : index
    %36 = vector.load %arg8[%c0_27, %c0_28] : memref<2x10xf32, #tpu.memory_space<vmem>>, vector<2x10xf32>
    tpu.vector_store %arg8[%c0_27, %c0_28], %35 {strides = array<i32>} : memref<2x10xf32, #tpu.memory_space<vmem>>, vector<2x10xf32>,
    return
  }
  func.func @transform_0(%arg0: i32) -> (i32, i32, i32) {
    %c0_i32 = arith.constant 0 : i32
    %c0_i32_0 = arith.constant 0 : i32
    %c0_i32_1 = arith.constant 0 : i32
    return %c0_i32, %c0_i32_0, %arg0 : i32, i32, i32
  }
  func.func @transform_1(%arg0: i32) -> (i32, i32) {
    %c0_i32 = arith.constant 0 : i32
    %c0_i32_0 = arith.constant 0 : i32
    %c0_i32_1 = arith.constant 0 : i32
    return %c0_i32, %c0_i32_0 : i32, i32
  }
  func.func @transform_2(%arg0: i32) -> (i32, i32) {
    %c0_i32 = arith.constant 0 : i32
    %c0_i32_0 = arith.constant 0 : i32
    %c0_i32_1 = arith.constant 0 : i32
    return %c0_i32, %c0_i32_0 : i32, i32
  }
  func.func @transform_3(%arg0: i32) -> (i32, i32) {
    %c0_i32 = arith.constant 0 : i32
    %c0_i32_0 = arith.constant 0 : i32
    %c0_i32_1 = arith.constant 0 : i32
    return %c0_i32, %c0_i32_0 : i32, i32
  }
  func.func @transform_4(%arg0: i32) -> (i32, i32) {
    %c0_i32 = arith.constant 0 : i32
    %c0_i32_0 = arith.constant 0 : i32
    %c0_i32_1 = arith.constant 0 : i32
    return %c0_i32, %c0_i32_0 : i32, i32
  }
  func.func @transform_5(%arg0: i32) -> (i32, i32) {
    %c0_i32 = arith.constant 0 : i32
    %c0_i32_0 = arith.constant 0 : i32
    %c0_i32_1 = arith.constant 0 : i32
    return %c0_i32, %c0_i32_0 : i32, i32
  }
  func.func @transform_6(%arg0: i32) -> (i32, i32) {
    %c0_i32 = arith.constant 0 : i32
    %c0_i32_0 = arith.constant 0 : i32
    %c0_i32_1 = arith.constant 0 : i32
    return %c0_i32, %c0_i32_0 : i32, i32
  }
  func.func @transform_7(%arg0: i32) -> (i32, i32) {
    %c0_i32 = arith.constant 0 : i32
    %c0_i32_0 = arith.constant 0 : i32
    return %arg0, %c0_i32 : i32, i32
  }
}

</mosaic_0001>

<bundles_post_ra>
// kernel: cnn_forward.3
= control target key start
LH: loop header
LB: loop body
LE: loop exit
PB: predicated region body
PF: predicated region fallthrough
CT: control target
= control target key end

     0   :  { %v817_v3 = vmov 0.0   ;;  %v818_v8 = vmov 0   ;;  %vm31_vm0 = vcmask 261120   ;;  %s1069_s0 = inlined_call_operand.vmem [shape: f32[4,32,512], index: 0, kind: input, shape index: {}]   ;;  %s1070_s1 = inlined_call_operand.vmem [shape: f32[4,32], index: 1, kind: input, shape index: {}]   ;;  %s1071_s2 = inlined_call_operand.vmem [shape: f32[4,1], index: 2, kind: input, shape index: {}]   ;;  %s1072_s3 = inlined_call_operand.vmem [shape: f32[4,512], index: 3, kind: output, shape index: {}]  }
   0x1   :  { %v16_v0 = vld [vmem:[%s1069_s0 + $0x8] sm:$0xff]  ;;  %v18_v2 = vld [vmem:[%s1069_s0 + $0x18] sm:$0xff]  ;;  %99 = vmatprep.mubr.f32.mxu0 %v817_v3  ;;  %170 = vmatprep.mubr.f32.mxu1 %v817_v3  ;;  %v15_v6 = vld [vmem:[%s1069_s0] sm:$0xff] }
   0x2   :  { %v20_v1 = vld [vmem:[%s1069_s0 + $0x28] sm:$0xff]  ;;  %v22_v5 = vld [vmem:[%s1069_s0 + $0x38] sm:$0xff]  ;;  %v19_v7 = vld [vmem:[%s1069_s0 + $0x20] sm:$0xff]  ;;  %816 = vset.pattern.permute.xlu0 %v818_v8 }
   0x3   :  { %v750_v4 = vpack.c.bf16 %v20_v1, %v16_v0  ;;  %v758_v9 = vpack.c.bf16 %v22_v5, %v18_v2  ;;  %v752_v10 = vpack.c.bf16 %v19_v7, %v15_v6  ;;  %v17_v11 = vld [vmem:[%s1069_s0 + $0x10] sm:$0xff]  ;;  %v24_v13 = vld [vmem:[%s1069_s0 + $0x48] sm:$0xff]  ;;  %v26_v16 = vld [vmem:[%s1069_s0 + $0x58] sm:$0xff] }
   0x4   :  { %v21_v12 = vld [vmem:[%s1069_s0 + $0x30] sm:$0xff]  ;;  %v28_v15 = vld [vmem:[%s1069_s0 + $0x68] sm:$0xff]  ;;  %v30_v17 = vld [vmem:[%s1069_s0 + $0x78] sm:$0xff] }
   0x5   :  { %751 = vmatprep.subr.bf16.mxu0 %v750_v4  ;;  %v760_v14 = vpack.c.bf16 %v21_v12, %v17_v11  ;;  %759 = vmatprep.subr.bf16.mxu1 %v758_v9  ;;  %v754_v18 = vpack.c.bf16 %v28_v15, %v24_v13  ;;  %v762_v19 = vpack.c.bf16 %v30_v17, %v26_v16  ;;  %v23_v20 = vld [vmem:[%s1069_s0 + $0x40] sm:$0xff]  ;;  %v25_v22 = vld [vmem:[%s1069_s0 + $0x50] sm:$0xff]  ;;  %v697_v25 = vld [vmem:[%s1069_s0 + $0x88] sm:$0xff] }
   0x6   :  { %753 = vmatpush1.bf16.msra.mxu0 %v752_v10  ;;  %v27_v21 = vld [vmem:[%s1069_s0 + $0x60] sm:$0xff]  ;;  %v29_v24 = vld [vmem:[%s1069_s0 + $0x70] sm:$0xff]  ;;  %v701_v28 = vld [vmem:[%s1069_s0 + $0xa8] sm:$0xff] }
   0x7   :  { %761 = vmatpush1.bf16.msra.mxu1 %v760_v14  ;;  %v756_v23 = vpack.c.bf16 %v27_v21, %v23_v20  ;;  %755 = vmatprep.subr.bf16.mxu0 %v754_v18  ;;  %v764_v26 = vpack.c.bf16 %v29_v24, %v25_v22  ;;  %v895_v27 = vld [vmem:[%s1070_s1] sm:$0xf]  ;;  %v699_v29 = vld [vmem:[%s1069_s0 + $0x98] sm:$0xff]  ;;  %v766_v31 = vpack.c.bf16 %v701_v28, %v697_v25  ;;  %v698_v35 = vld [vmem:[%s1069_s0 + $0x90] sm:$0xff] }
   0x8   :  { %763 = vmatprep.subr.bf16.mxu1 %v762_v19  ;;  %v703_v30 = vld [vmem:[%s1069_s0 + $0xb8] sm:$0xff]  ;;  %v696_v33 = vld [vmem:[%s1069_s0 + $0x80] sm:$0xff]  ;;  %v702_v37 = vld [vmem:[%s1069_s0 + $0xb0] sm:$0xff] }
   0x9   :  { %v774_v32 = vpack.c.bf16 %v703_v30, %v699_v29  ;;  %v700_v34 = vld [vmem:[%s1069_s0 + $0xa0] sm:$0xff]  ;;  %v705_v38 = vld [vmem:[%s1069_s0 + $0xc8] sm:$0xff]  ;;  %v776_v40 = vpack.c.bf16 %v702_v37, %v698_v35  ;;  %v707_v42 = vld [vmem:[%s1069_s0 + $0xd8] sm:$0xff] }
   0xa   :  { %757 = vmatpush1.bf16.msra.mxu0 %v756_v23  ;;  %v768_v36 = vpack.c.bf16 %v700_v34, %v696_v33  ;;  %v709_v39 = vld [vmem:[%s1069_s0 + $0xe8] sm:$0xff]  ;;  %v711_v43 = vld [vmem:[%s1069_s0 + $0xf8] sm:$0xff]  ;;  %v704_v44 = vld [vmem:[%s1069_s0 + $0xc0] sm:$0xff] }
   0xb   :  { %765 = vmatpush1.bf16.msra.mxu1 %v764_v26  ;;  %767 = vmatprep.subr.bf16.mxu0 %v766_v31  ;;  %v770_v41 = vpack.c.bf16 %v709_v39, %v705_v38  ;;  %v778_v45 = vpack.c.bf16 %v711_v43, %v707_v42  ;;  %v708_v46 = vld [vmem:[%s1069_s0 + $0xe0] sm:$0xff]  ;;  %v706_v47 = vld [vmem:[%s1069_s0 + $0xd0] sm:$0xff]  ;;  %v715_v49 = vld [vmem:[%s1069_s0 + $0x108] sm:$0xff] }
   0xc   :  { %775 = vmatprep.subr.bf16.mxu1 %v774_v32  ;;  %v710_v48 = vld [vmem:[%s1069_s0 + $0xf0] sm:$0xff]  ;;  %v719_v50 = vld [vmem:[%s1069_s0 + $0x128] sm:$0xff]  ;;  %v717_v51 = vld [vmem:[%s1069_s0 + $0x118] sm:$0xff]  ;;  %v772_v52 = vpack.c.bf16 %v708_v46, %v704_v44 }
   0xd   :  { %694 = vmatmul.mubr.msk.f32.vlgmr.msra.gmra.mrb[0].mxu0 %vm31_vm0, %v895_v27  ;;  %v721_v53 = vld [vmem:[%s1069_s0 + $0x138] sm:$0xff]  ;;  %v780_v54 = vpack.c.bf16 %v710_v48, %v706_v47  ;;  %v782_v55 = vpack.c.bf16 %v719_v50, %v715_v49  ;;  %v714_v56 = vld [vmem:[%s1069_s0 + $0x100] sm:$0xff]  ;;  %v716_v58 = vld [vmem:[%s1069_s0 + $0x110] sm:$0xff] }
   0xe   :  { %695 = vmatmul.mubr.msk.f32.vlgmr.msra.gmra.mrb[0].mxu1 %vm31_vm0, %v895_v27  ;;  %769 = vmatpush1.bf16.msra.mxu0 %v768_v36  ;;  %v718_v57 = vld [vmem:[%s1069_s0 + $0x120] sm:$0xff]  ;;  %v790_v59 = vpack.c.bf16 %v721_v53, %v717_v51  ;;  %v720_v60 = vld [vmem:[%s1069_s0 + $0x130] sm:$0xff]  ;;  %v723_v61 = vld [vmem:[%s1069_s0 + $0x148] sm:$0xff] }
   0xf   :  { %777 = vmatpush1.bf16.msra.mxu1 %v776_v40  ;;  %771 = vmatprep.subr.bf16.mxu0 %v770_v41  ;;  %v727_v62 = vld [vmem:[%s1069_s0 + $0x168] sm:$0xff]  ;;  %v725_v63 = vld [vmem:[%s1069_s0 + $0x158] sm:$0xff]  ;;  %v784_v1 = vpack.c.bf16 %v718_v57, %v714_v56  ;;  %v792_v2 = vpack.c.bf16 %v720_v60, %v716_v58  ;;  %v722_v5 = vld [vmem:[%s1069_s0 + $0x140] sm:$0xff] }
  0x10   :  { %779 = vmatprep.subr.bf16.mxu1 %v778_v45  ;;  %258 = vmatprep.mubr.f32.mxu0 %v817_v3  ;;  %v729_v0 = vld [vmem:[%s1069_s0 + $0x178] sm:$0xff]  ;;  %v786_v4 = vpack.c.bf16 %v727_v62, %v723_v61  ;;  %v726_v6 = vld [vmem:[%s1069_s0 + $0x160] sm:$0xff]  ;;  %v724_v7 = vld [vmem:[%s1069_s0 + $0x150] sm:$0xff] }
  0x11   :  { %329 = vmatprep.mubr.f32.mxu1 %v817_v3  ;;  %v794_v8 = vpack.c.bf16 %v729_v0, %v725_v63  ;;  %v728_v9 = vld [vmem:[%s1069_s0 + $0x170] sm:$0xff]  ;;  %v733_v10 = vld [vmem:[%s1069_s0 + $0x188] sm:$0xff]  ;;  %v735_v12 = vld [vmem:[%s1069_s0 + $0x198] sm:$0xff]  ;;  %v788_v14 = vpack.c.bf16 %v726_v6, %v722_v5 }
  0x12   :  { %773 = vmatpush1.bf16.msra.mxu0 %v772_v52  ;;  %v737_v11 = vld [vmem:[%s1069_s0 + $0x1a8] sm:$0xff]  ;;  %v739_v13 = vld [vmem:[%s1069_s0 + $0x1b8] sm:$0xff]  ;;  %v732_v15 = vld [vmem:[%s1069_s0 + $0x180] sm:$0xff]  ;;  %v796_v16 = vpack.c.bf16 %v728_v9, %v724_v7 }
  0x13   :  { %781 = vmatpush1.bf16.msra.mxu1 %v780_v54  ;;  %783 = vmatprep.subr.bf16.mxu0 %v782_v55  ;;  %v798_v17 = vpack.c.bf16 %v737_v11, %v733_v10  ;;  %v736_v18 = vld [vmem:[%s1069_s0 + $0x1a0] sm:$0xff]  ;;  %v734_v19 = vld [vmem:[%s1069_s0 + $0x190] sm:$0xff]  ;;  %v806_v21 = vpack.c.bf16 %v739_v13, %v735_v12  ;;  %v741_v23 = vld [vmem:[%s1069_s0 + $0x1c8] sm:$0xff] }
  0x14   :  { %791 = vmatprep.subr.bf16.mxu1 %v790_v59  ;;  %v666_v20 = vld [vmem:[%s1071_s2] sm:$0xf]  ;;  %v738_v22 = vld [vmem:[%s1069_s0 + $0x1b0] sm:$0xff]  ;;  %v745_v24 = vld [vmem:[%s1069_s0 + $0x1e8] sm:$0xff]  ;;  %v800_v28 = vpack.c.bf16 %v736_v18, %v732_v15 }
  0x15   :  { %712 = vmatmul.mubr.msk.f32.vlgmr.msra.gmra.mrb[2].mxu0 %vm31_vm0, %v895_v27  ;;  %v743_v25 = vld [vmem:[%s1069_s0 + $0x1d8] sm:$0xff]  ;;  %669 = vperm.xlu0 %816, %v666_v20   ;;  %v808_v29 = vpack.c.bf16 %v738_v22, %v734_v19  ;;  %v802_v30 = vpack.c.bf16 %v745_v24, %v741_v23  ;;  %v740_v31 = vld [vmem:[%s1069_s0 + $0x1c0] sm:$0xff]  ;;  %v742_v34 = vld [vmem:[%s1069_s0 + $0x1d0] sm:$0xff] }
  0x16   :  { %713 = vmatmul.mubr.msk.f32.vlgmr.msra.gmra.mrb[2].mxu1 %vm31_vm0, %v895_v27  ;;  %785 = vmatpush1.bf16.msra.mxu0 %v784_v1  ;;  %v747_v26 = vld [vmem:[%s1069_s0 + $0x1f8] sm:$0xff]  ;;  %v744_v32 = vld [vmem:[%s1069_s0 + $0x1e0] sm:$0xff]  ;;  %v746_v35 = vld [vmem:[%s1069_s0 + $0x1f0] sm:$0xff] }
  0x17   :  { %793 = vmatpush1.bf16.msra.mxu1 %v792_v2  ;;  %787 = vmatprep.subr.bf16.mxu0 %v786_v4  ;;  %v810_v33 = vpack.c.bf16 %v747_v26, %v743_v25  ;;  %v804_v36 = vpack.c.bf16 %v744_v32, %v740_v31  ;;  %v812_v37 = vpack.c.bf16 %v746_v35, %v742_v34 }
  0x18   :  { %795 = vmatprep.subr.bf16.mxu1 %v794_v8  ;;  %417 = vmatprep.mubr.f32.mxu0 %v817_v3 }
  0x19   :  { %488 = vmatprep.mubr.f32.mxu1 %v817_v3 }
  0x1a   :  { %789 = vmatpush1.bf16.msra.mxu0 %v788_v14 }
  0x1b   :  { %797 = vmatpush1.bf16.msra.mxu1 %v796_v16  ;;  %799 = vmatprep.subr.bf16.mxu0 %v798_v17 }
  0x1c   :  { %807 = vmatprep.subr.bf16.mxu1 %v806_v21 }
  0x1d   :  { %730 = vmatmul.mubr.msk.f32.vlgmr.msra.gmra.mrb[4].mxu0 %vm31_vm0, %v895_v27 }
  0x1e   :  { %731 = vmatmul.mubr.msk.f32.vlgmr.msra.gmra.mrb[4].mxu1 %vm31_vm0, %v895_v27  ;;  %801 = vmatpush1.bf16.msra.mxu0 %v800_v28 }
  0x1f   :  { %809 = vmatpush1.bf16.msra.mxu1 %v808_v29  ;;  %803 = vmatprep.subr.bf16.mxu0 %v802_v30 }
  0x20   :  { %811 = vmatprep.subr.bf16.mxu1 %v810_v33  ;;  %576 = vmatprep.mubr.f32.mxu0 %v817_v3 }
  0x21   :  { %647 = vmatprep.mubr.f32.mxu1 %v817_v3 }
  0x22   :  { %805 = vmatpush1.bf16.msra.mxu0 %v804_v36 }
  0x23   :  { %813 = vmatpush1.bf16.msra.mxu1 %v812_v37 }
  0x25   :  { %748 = vmatmul.mubr.msk.f32.vlgmr.msra.gmra.mrb[6].mxu0 %vm31_vm0, %v895_v27 }
  0x26   :  { %749 = vmatmul.mubr.msk.f32.vlgmr.msra.gmra.mrb[6].mxu1 %vm31_vm0, %v895_v27 }
  0x94   :  { %v670_v59 = vpop.permute.xlu0 %669 }
  0xe0   :  { %v101_v38 = vpop.f32.mrb[0].mxu0 }
  0xe1   :  { %v172_v39 = vpop.f32.mrb[0].mxu1  ;;  %v103_v40 = vpop.f32.mrb[1].mxu0 }
  0xe2   :  { %v174_v41 = vpop.f32.mrb[1].mxu1 }
  0xe8   :  { %v260_v42 = vpop.f32.mrb[2].mxu0 }
  0xe9   :  { %v654_v43 = vmax.f32 %v101_v38, %v260_v42  ;;  %v331_v44 = vpop.f32.mrb[2].mxu1  ;;  %v262_v45 = vpop.f32.mrb[3].mxu0 }
  0xea   :  { %v656_v46 = vmax.f32 %v172_v39, %v331_v44  ;;  %v655_v47 = vmax.f32 %v103_v40, %v262_v45  ;;  %v333_v48 = vpop.f32.mrb[3].mxu1 }
  0xeb   :  { %v657_v3 = vmax.f32 %v174_v41, %v333_v48 }
  0xf0   :  { %v419_v49 = vpop.f32.mrb[4].mxu0 }
  0xf1   :  { %v490_v50 = vpop.f32.mrb[4].mxu1  ;;  %v421_v51 = vpop.f32.mrb[5].mxu0 }
  0xf2   :  { %v492_v52 = vpop.f32.mrb[5].mxu1 }
  0xf8   :  { %v578_v53 = vpop.f32.mrb[6].mxu0 }
  0xf9   :  { %v658_v54 = vmax.f32 %v419_v49, %v578_v53  ;;  %v649_v55 = vpop.f32.mrb[6].mxu1  ;;  %v580_v27 = vpop.f32.mrb[7].mxu0 }
  0xfa   :  { %v660_v56 = vmax.f32 %v490_v50, %v649_v55  ;;  %v659_v57 = vmax.f32 %v421_v51, %v580_v27  ;;  %v651_v58 = vpop.f32.mrb[7].mxu1 }
  0xfb   :  { %v662_v60 = vmax.f32 %v654_v43, %v658_v54  ;;  %v661_v61 = vmax.f32 %v492_v52, %v651_v58 }
  0xfc   :  { %v664_v62 = vmax.f32 %v656_v46, %v660_v56  ;;  %v663_v63 = vmax.f32 %v655_v47, %v659_v57 }
  0xfd   :  { %v665_v0 = vmax.f32 %v657_v3, %v661_v61  ;;  %v672_v1 = vadd.f32 %v670_v59, %v662_v60 }
  0xfe   :  { %v673_v2 = vadd.f32 %v670_v59, %v663_v63  ;;  %v674_v4 = vadd.f32 %v670_v59, %v664_v62 }
  0xff   :  { %v675_v5 = vadd.f32 %v670_v59, %v665_v0  ;;  %v676_v6 = vmax.f32 %v672_v1, 0.0 }
 0x100   :  { %v677_v7 = vmax.f32 %v673_v2, 0.0  ;;  %v678_v8 = vmax.f32 %v674_v4, 0.0 }
 0x101   :  { %v679_v9 = vmax.f32 %v675_v5, 0.0 }
 0x102   :  { %v684_v10 = vcombine.low %v676_v6, %v677_v7 }
 0x103   :  { %v685_v11 = vcombine.low %v678_v8, %v679_v9 }
 0x104   :  { %688 = vst [vmem:[%s1072_s3] sm:$0xff] %v684_v10 }
 0x105   :  { %689 = vst [vmem:[%s1072_s3 + $0x8] sm:$0xff] %v685_v11 }

// kernel: cnn_forward.4
= control target key start
LH: loop header
LB: loop body
LE: loop exit
PB: predicated region body
PF: predicated region fallthrough
CT: control target
= control target key end

     0   :  { %v462_v0 = vmov 0.0|0.0   ;;  %vm463_vm0 = vmmov 0   ;;  %v464_v8 = vmov 0.0   ;;  %v465_v12 = vmov 0   ;;  %s563_s0 = inlined_call_operand.vmem [shape: f32[4,40,128], index: 0, kind: input, shape index: {}]   ;;  %s564_s2 = inlined_call_operand.vmem [shape: f32[8,1], index: 2, kind: input, shape index: {}]   ;;  %s565_s1 = inlined_call_operand.vmem [shape: f32[8,40], index: 1, kind: input, shape index: {}]   ;;  %s566_s3 = inlined_call_operand.vmem [shape: f32[8,128], index: 3, kind: output, shape index: {}]  }
   0x1   :  { %433 = vmatprep.subr.bf16.mxu0 %v462_v0  ;;  %439 = vmatprep.subr.bf16.mxu1 %v462_v0  ;;  %v15_v1 = vld [vmem:[%s563_s0] sm:$0xff]  ;;  %v16_v2 = vld [vmem:[%s563_s0 + $0x8] sm:$0xff]  ;;  %v340_v5 = vld [vmem:[%s563_s0 + $0x30] sm:$0xff]  ;;  %vm20_vm1 = vcmask 326656  }
   0x2   :  { %v339_v3 = vld [vmem:[%s563_s0 + $0x28] sm:$0xff]  ;;  %v434_v4 = vpack.c.bf16 %v16_v2, %v15_v1  ;;  %v17_v6 = vld [vmem:[%s563_s0 + $0x10] sm:$0xff]  ;;  %v18_v7 = vld [vmem:[%s563_s0 + $0x18] sm:$0xff]  ;;  %391 = vmatprep.mubr.msk.f32.mxu0 %vm463_vm0, %v464_v8  ;;  %404 = vmatprep.mubr.msk.f32.mxu1 %vm463_vm0, %v464_v8 }
   0x3   :  { %v440_v9 = vpack.c.bf16 %v340_v5, %v339_v3  ;;  %v341_v10 = vld [vmem:[%s563_s0 + $0x38] sm:$0xff]  ;;  %v342_v11 = vld [vmem:[%s563_s0 + $0x40] sm:$0xff]  ;;  %461 = vset.pattern.permute.xlu0 %v465_v12  ;;  %v437_v13 = vpack.c.bf16 %v18_v7, %v17_v6  ;;  %v345_v15 = vld [vmem:[%s563_s0 + $0x50] sm:$0xff] }
   0x4   :  { %435 = vmatpush3.bf16.msra.mxu0 %v434_v4  ;;  %v443_v14 = vpack.c.bf16 %v342_v11, %v341_v10  ;;  %v346_v16 = vld [vmem:[%s563_s0 + $0x58] sm:$0xff]  ;;  %v325_v17 = vld [vmem:[%s564_s2] sm:$0xff]  ;;  %v343_v21 = vld [vmem:[%s563_s0 + $0x48] sm:$0xff] }
   0x5   :  { %441 = vmatpush3.bf16.msra.mxu1 %v440_v9  ;;  %436 = vmatprep.subr.bf16.mxu0 %v462_v0  ;;  %v19_v18 = vld [vmem:[%s563_s0 + $0x20] sm:$0xff]  ;;  %v351_v19 = vld [vmem:[%s563_s0 + $0x78] sm:$0xff]  ;;  %v446_v23 = vpack.c.bf16 %v346_v16, %v345_v15  ;;  %v348_v26 = vld [vmem:[%s563_s0 + $0x68] sm:$0xff] }
   0x6   :  { %442 = vmatprep.subr.bf16.mxu1 %v462_v0  ;;  %v352_v20 = vld [vmem:[%s563_s0 + $0x80] sm:$0xff]  ;;  %328 = vperm.xlu0 %461, %v325_v17   ;;  %v353_v27 = vld [vmem:[%s563_s0 + $0x88] sm:$0xff]  ;;  %v354_v28 = vld [vmem:[%s563_s0 + $0x90] sm:$0xff] }
   0x7   :  { %v14_v22 = vld [vmem:[%s565_s1] sm:$0xff]  ;;  %v452_v24 = vpack.c.bf16 %v352_v20, %v351_v19  ;;  %v455_v30 = vpack.c.bf16 %v354_v28, %v353_v27  ;;  %v349_v31 = vld [vmem:[%s563_s0 + $0x70] sm:$0xff]  ;;  %v355_v32 = vld [vmem:[%s563_s0 + $0x98] sm:$0xff] }
   0x8   :  { %438 = vmatpush3.bf16.msra.mxu0 %v437_v13  ;;  %v347_v25 = vld [vmem:[%s563_s0 + $0x60] sm:$0xff] }
   0x9   :  { %444 = vmatpush3.bf16.msra.mxu1 %v443_v14  ;;  %389 = vmatprep.subr.mxu0 %v464_v8  ;;  %v449_v29 = vpack.c.bf16 %v348_v26, %v347_v25 }
   0xa   :  { %402 = vmatprep.subr.mxu1 %v464_v8 }
   0xc   :  { %390 = vmatpush3.msra.mxu0 %v19_v18 }
   0xd   :  { %403 = vmatpush3.msra.mxu1 %v343_v21  ;;  %392 = vmatmul.mubr.msk.f32.vlgmr.msra.gmra.mrb[0].mxu0 %vm20_vm1, %v14_v22 }
   0xe   :  { %405 = vmatmul.mubr.msk.f32.vlgmr.msra.gmra.mrb[0].mxu1 %vm20_vm1, %v14_v22  ;;  %445 = vmatprep.subr.bf16.mxu0 %v462_v0 }
   0xf   :  { %451 = vmatprep.subr.bf16.mxu1 %v462_v0  ;;  %447 = vmatpush3.bf16.msra.mxu0 %v446_v23 }
  0x10   :  { %453 = vmatpush3.bf16.msra.mxu1 %v452_v24  ;;  %448 = vmatprep.subr.bf16.mxu0 %v462_v0 }
  0x11   :  { %454 = vmatprep.subr.bf16.mxu1 %v462_v0  ;;  %417 = vmatprep.mubr.msk.f32.mxu0 %vm463_vm0, %v464_v8 }
  0x12   :  { %430 = vmatprep.mubr.msk.f32.mxu1 %vm463_vm0, %v464_v8 }
  0x13   :  { %450 = vmatpush3.bf16.msra.mxu0 %v449_v29 }
  0x14   :  { %456 = vmatpush3.bf16.msra.mxu1 %v455_v30  ;;  %415 = vmatprep.subr.mxu0 %v464_v8 }
  0x15   :  { %428 = vmatprep.subr.mxu1 %v464_v8 }
  0x17   :  { %416 = vmatpush3.msra.mxu0 %v349_v31 }
  0x18   :  { %429 = vmatpush3.msra.mxu1 %v355_v32  ;;  %418 = vmatmul.mubr.msk.f32.vlgmr.msra.gmra.mrb[2].mxu0 %vm20_vm1, %v14_v22 }
  0x19   :  { %431 = vmatmul.mubr.msk.f32.vlgmr.msra.gmra.mrb[2].mxu1 %vm20_vm1, %v14_v22 }
  0x85   :  { %v329_v43 = vpop.permute.xlu0 %328 }
  0xe0   :  { %v90_v33 = vpop.f32.mrb[0].mxu0 }
  0xe1   :  { %v166_v34 = vpop.f32.mrb[0].mxu1  ;;  %v393_v35 = vpop.f32.mrb[1].mxu0 }
  0xe2   :  { %v322_v36 = vmax.f32 %v90_v33, %v166_v34  ;;  %v406_v37 = vpop.f32.mrb[1].mxu1 }
  0xeb   :  { %v242_v38 = vpop.f32.mrb[2].mxu0 }
  0xec   :  { %v318_v39 = vpop.f32.mrb[2].mxu1  ;;  %v419_v40 = vpop.f32.mrb[3].mxu0 }
  0xed   :  { %v323_v41 = vmax.f32 %v242_v38, %v318_v39  ;;  %v432_v42 = vpop.f32.mrb[3].mxu1 }
  0xef   :  { %v324_v44 = vmax.f32 %v322_v36, %v323_v41 }
  0xf1   :  { %v331_v45 = vadd.f32 %v329_v43, %v324_v44 }
  0xf3   :  { %v332_v46 = vmax.f32 %v331_v45, 0.0 }
  0xf5   :  { %333 = vst [vmem:[%s566_s3] sm:$0xff] %v332_v46 }

// kernel: cnn_forward.5
= control target key start
LH: loop header
LB: loop body
LE: loop exit
PB: predicated region body
PF: predicated region fallthrough
CT: control target
= control target key end

     0   :  { %v1937_v7 = vmov 0   ;;  %vm38_vm0 = vcmask 588800   ;;  %s2818_s0 = inlined_call_operand.vmem [shape: f32[4,72,32], index: 0, kind: input, shape index: {}]   ;;  %s2819_s1 = inlined_call_operand.vmem [shape: f32[16,72], index: 1, kind: input, shape index: {}]   ;;  %s2820_s2 = inlined_call_operand.vmem [shape: f32[16,1], index: 2, kind: input, shape index: {}]   ;;  %s2821_s3 = inlined_call_operand.vmem [shape: f32[256,512], index: 3, kind: input, shape index: {}]   ;;  %s2822_s4 = inlined_call_operand.vmem [shape: f32[1,512], index: 4, kind: input, shape index: {}]   ;;  %s2823_s5 = inlined_call_operand.vmem [shape: f32[512,10], index: 5, kind: input, shape index: {}]   ;;  %s2824_s6 = inlined_call_operand.vmem [shape: f32[1,10], index: 6, kind: input, shape index: {}]   ;;  %s2825_s7 = inlined_call_operand.hbm [shape: f32[2,10], index: 7, kind: output, shape index: {}]  }
   0x1   :  { %v29_v0 = vld [vmem:[%s2818_s0] sm:$0xff]  ;;  %v30_v1 = vld [vmem:[%s2818_s0 + $0x8] sm:$0xff]  ;;  %v1372_v4 = vld [vmem:[%s2818_s0 + $0x50] sm:$0xff]  ;;  %1877 = vset.pattern.permute.xlu0 %v1937_v7 }
   0x2   :  { %v1371_v2 = vld [vmem:[%s2818_s0 + $0x48] sm:$0xff]  ;;  %v1609_v3 = vpack.c.bf16 %v30_v1, %v29_v0  ;;  %v31_v5 = vld [vmem:[%s2818_s0 + $0x10] sm:$0xff]  ;;  %v32_v6 = vld [vmem:[%s2818_s0 + $0x18] sm:$0xff] }
   0x3   :  { %v1625_v8 = vpack.c.bf16 %v1372_v4, %v1371_v2  ;;  %v1613_v9 = vpack.c.bf16 %v32_v6, %v31_v5  ;;  %v1373_v10 = vld [vmem:[%s2818_s0 + $0x58] sm:$0xff]  ;;  %v1374_v11 = vld [vmem:[%s2818_s0 + $0x60] sm:$0xff]  ;;  %v34_v14 = vld [vmem:[%s2818_s0 + $0x28] sm:$0xff] }
   0x4   :  { %v33_v12 = vld [vmem:[%s2818_s0 + $0x20] sm:$0xff]  ;;  %1610 = vmatprep.subr.bf16.mxu0 %v1609_v3  ;;  %v1629_v13 = vpack.c.bf16 %v1374_v11, %v1373_v10  ;;  %v1375_v15 = vld [vmem:[%s2818_s0 + $0x68] sm:$0xff]  ;;  %v1376_v16 = vld [vmem:[%s2818_s0 + $0x70] sm:$0xff] }
   0x5   :  { %1626 = vmatprep.subr.bf16.mxu1 %v1625_v8  ;;  %1612 = vmatpush3.bf16.msra.mxu0 %v1609_v3  ;;  %v1617_v17 = vpack.c.bf16 %v34_v14, %v33_v12  ;;  %v1633_v18 = vpack.c.bf16 %v1376_v16, %v1375_v15  ;;  %v35_v19 = vld [vmem:[%s2818_s0 + $0x30] sm:$0xff]  ;;  %v36_v20 = vld [vmem:[%s2818_s0 + $0x38] sm:$0xff]  ;;  %v27_v21 = vld [vmem:[%s2819_s1] sm:$0xff] }
   0x6   :  { %1628 = vmatpush3.bf16.msra.mxu1 %v1625_v8  ;;  %1614 = vmatprep.subr.bf16.mxu0 %v1613_v9  ;;  %v1377_v22 = vld [vmem:[%s2818_s0 + $0x78] sm:$0xff]  ;;  %v1378_v23 = vld [vmem:[%s2818_s0 + $0x80] sm:$0xff]  ;;  %v1621_v24 = vpack.c.bf16 %v36_v20, %v35_v19  ;;  %v382_v26 = vld [vmem:[%s2820_s2 + $0x8] sm:$0xff] }
   0x7   :  { %1630 = vmatprep.subr.bf16.mxu1 %v1629_v13  ;;  %1543 = vmatprep.mubr.msk.f32.mxu0 %vm38_vm0, %v27_v21  ;;  %v1637_v25 = vpack.c.bf16 %v1378_v23, %v1377_v22 }
   0x8   :  { %1564 = vmatprep.mubr.msk.f32.mxu1 %vm38_vm0, %v27_v21 }
   0x9   :  { %1616 = vmatpush3.bf16.msra.mxu0 %v1613_v9 }
   0xa   :  { %1632 = vmatpush3.bf16.msra.mxu1 %v1629_v13  ;;  %1618 = vmatprep.subr.bf16.mxu0 %v1617_v17 }
   0xb   :  { %1634 = vmatprep.subr.bf16.mxu1 %v1633_v18 }
   0xd   :  { %1620 = vmatpush3.bf16.msra.mxu0 %v1617_v17 }
   0xe   :  { %1636 = vmatpush3.bf16.msra.mxu1 %v1633_v18  ;;  %1622 = vmatprep.subr.bf16.mxu0 %v1621_v24 }
   0xf   :  { %12 = vsyncpa [#allocation3], 0  ;;  %1638 = vmatprep.subr.bf16.mxu1 %v1637_v25  ;;  %v37_v27 = vld [vmem:[%s2818_s0 + $0x40] sm:$0xff]  ;;  %v1379_v28 = vld [vmem:[%s2818_s0 + $0x88] sm:$0xff]  ;;  %390 = vperm.xlu0 %1877, %v382_v26   ;;  %s1942_s25 = smov 32   ;;  %s1943_s10 = smov 16  }
  0x10   :  { %v1382_v29 = vld [vmem:[%s2818_s0 + $0x90] sm:$0xff]  ;;  %v1383_v30 = vld [vmem:[%s2818_s0 + $0x98] sm:$0xff]  ;;  %v381_v31 = vld [vmem:[%s2820_s2] sm:$0xff]  ;;  %s1944_s16 = smov 64   ;;  %s1945_s22 = smov 48   ;;  %vm825_vm1 = vcmask 130048  }
  0x11   :  { %1624 = vmatpush3.bf16.msra.mxu0 %v1621_v24  ;;  %v1393_v32 = vld [vmem:[%s2818_s0 + $0xd8] sm:$0xff]  ;;  %v1394_v33 = vld [vmem:[%s2818_s0 + $0xe0] sm:$0xff]  ;;  %v1385_v35 = vld [vmem:[%s2818_s0 + $0xa8] sm:$0xff]  ;;  %v1641_v37 = vpack.c.bf16 %v1383_v30, %v1382_v29  ;;  %s1947_s26 = smov 80   ;;  %vm827_vm2 = vcmask 261120   ;;  %vm829_vm3 = vcmask 392192  }
  0x12   :  { %1640 = vmatpush3.bf16.msra.mxu1 %v1637_v25  ;;  %1541 = vmatprep.subr.mxu0 %v37_v27  ;;  %v1384_v34 = vld [vmem:[%s2818_s0 + $0xa0] sm:$0xff]  ;;  %v28_v36 = vld [vmem:[%s2819_s1 + $0x8] sm:$0xff]  ;;  %v1396_v39 = vld [vmem:[%s2818_s0 + $0xf0] sm:$0xff]  ;;  %v1657_v40 = vpack.c.bf16 %v1394_v33, %v1393_v32  ;;  %vm831_vm4 = vcmask 523264   ;;  %vm833_vm5 = vcmask 654336   ;;  %vm835_vm6 = vcmask 785408  }
  0x13   :  { %1562 = vmatprep.subr.mxu1 %v1379_v28  ;;  %v1395_v38 = vld [vmem:[%s2818_s0 + $0xe8] sm:$0xff]  ;;  %385 = vperm.xlu0 %1877, %v381_v31   ;;  %v1645_v41 = vpack.c.bf16 %v1385_v35, %v1384_v34  ;;  %v1386_v43 = vld [vmem:[%s2818_s0 + $0xb0] sm:$0xff]  ;;  %v1387_v44 = vld [vmem:[%s2818_s0 + $0xb8] sm:$0xff]  ;;  %vm837_vm7 = vcmask 916480   ;;  %s1948_s1 = smov [#allocation2]   ;;  %vm1353_vm8 = vcmask 74752  }
  0x14   :  { %v1661_v42 = vpack.c.bf16 %v1396_v39, %v1395_v38  ;;  %v1397_v45 = vld [vmem:[%s2818_s0 + $0xf8] sm:$0xff]  ;;  %v1398_v46 = vld [vmem:[%s2818_s0 + $0x100] sm:$0xff]  ;;  %v1649_v47 = vpack.c.bf16 %v1387_v44, %v1386_v43  ;;  %v1389_v50 = vld [vmem:[%s2818_s0 + $0xc8] sm:$0xff] }
  0x15   :  { %1542 = vmatpush3.msra.mxu0 %v37_v27  ;;  %v1665_v48 = vpack.c.bf16 %v1398_v46, %v1397_v45  ;;  %v1388_v49 = vld [vmem:[%s2818_s0 + $0xc0] sm:$0xff]  ;;  %v1399_v51 = vld [vmem:[%s2818_s0 + $0x108] sm:$0xff]  ;;  %v1400_v52 = vld [vmem:[%s2818_s0 + $0x110] sm:$0xff] }
  0x16   :  { %1563 = vmatpush3.msra.mxu1 %v1379_v28  ;;  %1544 = vmatmul.mubr.msk.f32.vlgmr.msra.gmra.mrb[0].mxu0 %vm38_vm0, %v28_v36  ;;  %v1653_v53 = vpack.c.bf16 %v1389_v50, %v1388_v49  ;;  %v1669_v54 = vpack.c.bf16 %v1400_v52, %v1399_v51  ;;  %v1390_v55 = vld [vmem:[%s2818_s0 + $0xd0] sm:$0xff]  ;;  %v1401_v56 = vld [vmem:[%s2818_s0 + $0x118] sm:$0xff]  ;;  %s1938_s0 = smov 112   ;;  %v847_v13 = vld [vmem:[%s2821_s3 + $0x8] sm:$0xff] }
  0x17   :  { %1565 = vmatmul.mubr.msk.f32.vlgmr.msra.gmra.mrb[0].mxu1 %vm38_vm0, %v28_v36  ;;  %1642 = vmatprep.subr.bf16.mxu0 %v1641_v37  ;;  %v851_v14 = vld [vmem:[%s2821_s3 + $0x28] sm:$0xff]  ;;  %v849_v15 = vld [vmem:[%s2821_s3 + $0x18] sm:$0xff]  ;;  %v846_v18 = vld [vmem:[%s2821_s3] sm:$0xff] }
  0x18   :  { %1658 = vmatprep.subr.bf16.mxu1 %v1657_v40  ;;  %1644 = vmatpush3.bf16.msra.mxu0 %v1641_v37  ;;  %v1673_v16 = vpack.c.bf16 %v851_v14, %v847_v13  ;;  %v853_v17 = vld [vmem:[%s2821_s3 + $0x38] sm:$0xff]  ;;  %v850_v19 = vld [vmem:[%s2821_s3 + $0x20] sm:$0xff]  ;;  %v848_v22 = vld [vmem:[%s2821_s3 + $0x10] sm:$0xff] }
  0x19   :  { %1660 = vmatpush3.bf16.msra.mxu1 %v1657_v40  ;;  %1646 = vmatprep.subr.bf16.mxu0 %v1645_v41  ;;  %v1737_v20 = vpack.c.bf16 %v853_v17, %v849_v15  ;;  %v852_v23 = vld [vmem:[%s2821_s3 + $0x30] sm:$0xff]  ;;  %v855_v24 = vld [vmem:[%s2821_s3 + $0x48] sm:$0xff]  ;;  %v857_v27 = vld [vmem:[%s2821_s3 + $0x58] sm:$0xff] }
  0x1a   :  { %1662 = vmatprep.subr.bf16.mxu1 %v1661_v42  ;;  %1585 = vmatprep.mubr.msk.f32.mxu0 %vm38_vm0, %v27_v21  ;;  %v1739_v25 = vpack.c.bf16 %v852_v23, %v848_v22  ;;  %v859_v26 = vld [vmem:[%s2821_s3 + $0x68] sm:$0xff]  ;;  %v861_v28 = vld [vmem:[%s2821_s3 + $0x78] sm:$0xff]  ;;  %v854_v31 = vld [vmem:[%s2821_s3 + $0x40] sm:$0xff] }
  0x1b   :  { %1606 = vmatprep.mubr.msk.f32.mxu1 %vm38_vm0, %v27_v21  ;;  %v1675_v21 = vpack.c.bf16 %v850_v19, %v846_v18  ;;  %v1677_v29 = vpack.c.bf16 %v859_v26, %v855_v24  ;;  %v1741_v30 = vpack.c.bf16 %v861_v28, %v857_v27  ;;  %v858_v32 = vld [vmem:[%s2821_s3 + $0x60] sm:$0xff]  ;;  %v856_v33 = vld [vmem:[%s2821_s3 + $0x50] sm:$0xff]  ;;  %v867_v37 = vld [vmem:[%s2821_s3 + $0xa8] sm:$0xff] }
  0x1c   :  { %1648 = vmatpush3.bf16.msra.mxu0 %v1645_v41  ;;  %v1679_v34 = vpack.c.bf16 %v858_v32, %v854_v31  ;;  %v860_v35 = vld [vmem:[%s2821_s3 + $0x70] sm:$0xff]  ;;  %v865_v40 = vld [vmem:[%s2821_s3 + $0x98] sm:$0xff]  ;;  %v866_v44 = vld [vmem:[%s2821_s3 + $0xa0] sm:$0xff] }
  0x1d   :  { %1664 = vmatpush3.bf16.msra.mxu1 %v1661_v42  ;;  %1650 = vmatprep.subr.bf16.mxu0 %v1649_v47  ;;  %v1743_v38 = vpack.c.bf16 %v860_v35, %v856_v33  ;;  %v869_v41 = vld [vmem:[%s2821_s3 + $0xb8] sm:$0xff]  ;;  %v862_v42 = vld [vmem:[%s2821_s3 + $0x80] sm:$0xff]  ;;  %v864_v45 = vld [vmem:[%s2821_s3 + $0x90] sm:$0xff] }
  0x1e   :  { %1666 = vmatprep.subr.bf16.mxu1 %v1665_v48  ;;  %v1745_v43 = vpack.c.bf16 %v869_v41, %v865_v40  ;;  %v868_v46 = vld [vmem:[%s2821_s3 + $0xb0] sm:$0xff]  ;;  %v875_v49 = vld [vmem:[%s2821_s3 + $0xe8] sm:$0xff]  ;;  %v873_v50 = vld [vmem:[%s2821_s3 + $0xd8] sm:$0xff] }
  0x1f   :  { %v1747_v51 = vpack.c.bf16 %v868_v46, %v864_v45  ;;  %v890_v17 = vld [vmem:[%s2821_s3 + $0x160] sm:$0xff]  ;;  %v888_v18 = vld [vmem:[%s2821_s3 + $0x150] sm:$0xff]  ;;  %v899_v22 = vld [vmem:[%s2821_s3 + $0x1a8] sm:$0xff] }
  0x20   :  { %1652 = vmatpush3.bf16.msra.mxu0 %v1649_v47  ;;  %v1683_v47 = vpack.c.bf16 %v866_v44, %v862_v42  ;;  %v897_v23 = vld [vmem:[%s2821_s3 + $0x198] sm:$0xff]  ;;  %v894_v28 = vld [vmem:[%s2821_s3 + $0x180] sm:$0xff]  ;;  %v900_v32 = vld [vmem:[%s2821_s3 + $0x1b0] sm:$0xff] }
  0x21   :  { %1668 = vmatpush3.bf16.msra.mxu1 %v1665_v48  ;;  %1654 = vmatprep.subr.bf16.mxu0 %v1653_v53  ;;  %v871_v48 = vld [vmem:[%s2821_s3 + $0xc8] sm:$0xff]  ;;  %v901_v24 = vld [vmem:[%s2821_s3 + $0x1b8] sm:$0xff]  ;;  %v902_v40 = vld [vmem:[%s2821_s3 + $0x1c0] sm:$0xff] }
  0x22   :  { %1670 = vmatprep.subr.bf16.mxu1 %v1669_v54  ;;  %v1685_v52 = vpack.c.bf16 %v875_v49, %v871_v48  ;;  %v1761_v31 = vpack.c.bf16 %v901_v24, %v897_v23  ;;  %v903_v33 = vld [vmem:[%s2821_s3 + $0x1c8] sm:$0xff]  ;;  %v905_v35 = vld [vmem:[%s2821_s3 + $0x1d8] sm:$0xff]  ;;  %v906_v41 = vld [vmem:[%s2821_s3 + $0x1e0] sm:$0xff] }
  0x23   :  { %v904_v42 = vld [vmem:[%s2821_s3 + $0x1d0] sm:$0xff]  ;;  %v911_v45 = vld [vmem:[%s2821_s3 + $0x208] sm:$0xff]  ;;  %v917_v48 = vld [vmem:[%s2821_s3 + $0x238] sm:$0xff]  ;;  %v1703_v49 = vpack.c.bf16 %v906_v41, %v902_v40 }
  0x24   :  { %1656 = vmatpush3.bf16.msra.mxu0 %v1653_v53  ;;  %v877_v53 = vld [vmem:[%s2821_s3 + $0xf8] sm:$0xff]  ;;  %v908_v44 = vld [vmem:[%s2821_s3 + $0x1f0] sm:$0xff]  ;;  %v915_v46 = vld [vmem:[%s2821_s3 + $0x228] sm:$0xff] }
  0x25   :  { %1672 = vmatpush3.bf16.msra.mxu1 %v1669_v54  ;;  %1583 = vmatprep.subr.mxu0 %v1390_v55  ;;  %v870_v54 = vld [vmem:[%s2821_s3 + $0xc0] sm:$0xff] }
  0x26   :  { %1604 = vmatprep.subr.mxu1 %v1401_v56 }
  0x28   :  { %1584 = vmatpush3.msra.mxu0 %v1390_v55  ;;  %v874_v55 = vld [vmem:[%s2821_s3 + $0xe0] sm:$0xff] }
  0x29   :  { %1605 = vmatpush3.msra.mxu1 %v1401_v56  ;;  %1586 = vmatmul.mubr.msk.f32.vlgmr.msra.gmra.mrb[2].mxu0 %vm38_vm0, %v28_v36  ;;  %v1749_v56 = vpack.c.bf16 %v877_v53, %v873_v50  ;;  %v1767_v50 = vpack.c.bf16 %v908_v44, %v904_v42  ;;  %v914_v53 = vld [vmem:[%s2821_s3 + $0x220] sm:$0xff]  ;;  %v1941_v42 = vmov 0.0  }
  0x2a   :  { %1607 = vmatmul.mubr.msk.f32.vlgmr.msra.gmra.mrb[2].mxu1 %vm38_vm0, %v28_v36  ;;  %1674 = vmatprep.subr.bf16.mxu0 %v1673_v16  ;;  %v863_v36 = vld [vmem:[%s2821_s3 + $0x88] sm:$0xff]  ;;  %v886_v16 = vld [vmem:[%s2821_s3 + $0x140] sm:$0xff] }
  0x2b   :  { %1738 = vmatprep.subr.bf16.mxu1 %v1737_v20  ;;  %1676 = vmatpush1.bf16.msra.mxu0 %v1675_v21  ;;  %v1681_v39 = vpack.c.bf16 %v867_v37, %v863_v36  ;;  %v892_v20 = vld [vmem:[%s2821_s3 + $0x170] sm:$0xff]  ;;  %v895_v21 = vld [vmem:[%s2821_s3 + $0x188] sm:$0xff]  ;;  %v909_v36 = vld [vmem:[%s2821_s3 + $0x1f8] sm:$0xff] }
  0x2c   :  { %1740 = vmatpush1.bf16.msra.mxu1 %v1739_v25  ;;  %1678 = vmatprep.subr.bf16.mxu0 %v1677_v29  ;;  %v1695_v25 = vpack.c.bf16 %v890_v17, %v886_v16  ;;  %v1759_v26 = vpack.c.bf16 %v892_v20, %v888_v18  ;;  %v1697_v27 = vpack.c.bf16 %v899_v22, %v895_v21  ;;  %v898_v29 = vld [vmem:[%s2821_s3 + $0x1a0] sm:$0xff]  ;;  %v928_v16 = vld [vmem:[%s2821_s3 + $0x290] sm:$0xff]  ;;  %v939_v20 = vld [vmem:[%s2821_s3 + $0x2e8] sm:$0xff] }
  0x2d   :  { %1742 = vmatprep.subr.bf16.mxu1 %v1741_v30  ;;  %v896_v30 = vld [vmem:[%s2821_s3 + $0x190] sm:$0xff]  ;;  %v1699_v37 = vpack.c.bf16 %v898_v29, %v894_v28  ;;  %v937_v21 = vld [vmem:[%s2821_s3 + $0x2d8] sm:$0xff] }
  0x2e   :  { %v932_v18 = vld [vmem:[%s2821_s3 + $0x2b0] sm:$0xff]  ;;  %v941_v22 = vld [vmem:[%s2821_s3 + $0x2f8] sm:$0xff] }
  0x2f   :  { %1680 = vmatpush1.bf16.msra.mxu0 %v1679_v34  ;;  %v907_v34 = vld [vmem:[%s2821_s3 + $0x1e8] sm:$0xff]  ;;  %v1779_v24 = vpack.c.bf16 %v932_v18, %v928_v16  ;;  %v1781_v28 = vpack.c.bf16 %v941_v22, %v937_v21  ;;  %v936_v29 = vld [vmem:[%s2821_s3 + $0x2d0] sm:$0xff] }
  0x30   :  { %1744 = vmatpush1.bf16.msra.mxu1 %v1743_v38  ;;  %1682 = vmatprep.subr.bf16.mxu0 %v1681_v39  ;;  %v1763_v38 = vpack.c.bf16 %v900_v32, %v896_v30  ;;  %v1701_v39 = vpack.c.bf16 %v907_v34, %v903_v33  ;;  %v940_v30 = vld [vmem:[%s2821_s3 + $0x2f0] sm:$0xff]  ;;  %v1939_v33 = vmov 1983009808  }
  0x31   :  { %1746 = vmatprep.subr.bf16.mxu1 %v1745_v43  ;;  %v1765_v43 = vpack.c.bf16 %v909_v36, %v905_v35  ;;  %v1783_v32 = vpack.c.bf16 %v940_v30, %v936_v29  ;;  %v407_v34 = vunpack.c.l.s4 %v1939_v33  ;;  %v409_v35 = vlaneseq }
  0x33   :  { %1684 = vmatpush1.bf16.msra.mxu0 %v1683_v47  ;;  %v913_v47 = vld [vmem:[%s2821_s3 + $0x218] sm:$0xff]  ;;  %v408_v36 = vunpack.c.0.s8 %v407_v34 }
  0x34   :  { %1748 = vmatpush1.bf16.msra.mxu1 %v1747_v51  ;;  %1686 = vmatprep.subr.bf16.mxu0 %v1685_v52  ;;  %v1705_v51 = vpack.c.bf16 %v915_v46, %v911_v45  ;;  %v910_v52 = vld [vmem:[%s2821_s3 + $0x200] sm:$0xff] }
  0x35   :  { %1750 = vmatprep.subr.bf16.mxu1 %v1749_v56  ;;  %v916_v56 = vld [vmem:[%s2821_s3 + $0x230] sm:$0xff] }
  0x8e   :  { %v391_v63 = vpop.permute.xlu0 %390 }
  0x92   :  { %v386_v7 = vpop.permute.xlu0 %385 }
  0xe9   :  { %v1545_v57 = vpop.f32.mrb[0].mxu0 }
  0xea   :  { %v1566_v58 = vpop.f32.mrb[0].mxu1  ;;  %v111_v59 = vpop.f32.mrb[1].mxu0 }
  0xeb   :  { %v376_v60 = vmax.f32 %v1545_v57, %v1566_v58  ;;  %v196_v61 = vpop.f32.mrb[1].mxu1  ;;  %v872_v57 = vld [vmem:[%s2821_s3 + $0xd0] sm:$0xff] }
  0xec   :  { %v375_v62 = vmax.f32 %v111_v59, %v196_v61  ;;  %v876_v58 = vld [vmem:[%s2821_s3 + $0xf0] sm:$0xff]  ;;  %v879_v59 = vld [vmem:[%s2821_s3 + $0x108] sm:$0xff]  ;;  %v881_v61 = vld [vmem:[%s2821_s3 + $0x118] sm:$0xff] }
  0xfc   :  { %v1587_v0 = vpop.f32.mrb[2].mxu0 }
  0xfd   :  { %v1608_v1 = vpop.f32.mrb[2].mxu1  ;;  %v281_v2 = vpop.f32.mrb[3].mxu0 }
  0xfe   :  { %v378_v3 = vmax.f32 %v1587_v0, %v1608_v1  ;;  %v366_v4 = vpop.f32.mrb[3].mxu1  ;;  %v1751_v0 = vpack.c.bf16 %v876_v58, %v872_v57  ;;  %v919_v57 = vld [vmem:[%s2821_s3 + $0x248] sm:$0xff] }
  0xff   :  { %v377_v5 = vmax.f32 %v281_v2, %v366_v4  ;;  %v878_v2 = vld [vmem:[%s2821_s3 + $0x100] sm:$0xff]  ;;  %v880_v4 = vld [vmem:[%s2821_s3 + $0x110] sm:$0xff]  ;;  %v923_v58 = vld [vmem:[%s2821_s3 + $0x268] sm:$0xff] }
 0x100   :  { %v380_v6 = vmax.f32 %v376_v60, %v378_v3  ;;  %v883_v60 = vld [vmem:[%s2821_s3 + $0x128] sm:$0xff]  ;;  %v882_v3 = vld [vmem:[%s2821_s3 + $0x120] sm:$0xff]  ;;  %1752 = vmatpush1.bf16.msra.mxu1 %v1751_v0 }
 0x101   :  { %v379_v8 = vmax.f32 %v375_v62, %v377_v5  ;;  %v885_v62 = vld [vmem:[%s2821_s3 + $0x138] sm:$0xff]  ;;  %v1689_v1 = vpack.c.bf16 %v883_v60, %v879_v59  ;;  %v1691_v13 = vpack.c.bf16 %v882_v3, %v878_v2  ;;  %v918_v0 = vld [vmem:[%s2821_s3 + $0x240] sm:$0xff]  ;;  %v920_v2 = vld [vmem:[%s2821_s3 + $0x250] sm:$0xff] }
 0x102   :  { %v394_v9 = vadd.f32 %v391_v63, %v380_v6  ;;  %v1687_v63 = vpack.c.bf16 %v874_v55, %v870_v54  ;;  %v1753_v5 = vpack.c.bf16 %v885_v62, %v881_v61  ;;  %v884_v6 = vld [vmem:[%s2821_s3 + $0x130] sm:$0xff]  ;;  %v1769_v55 = vpack.c.bf16 %v917_v48, %v913_v47  ;;  %v921_v59 = vld [vmem:[%s2821_s3 + $0x258] sm:$0xff] }
 0x103   :  { %v393_v10 = vadd.f32 %v386_v7, %v379_v8  ;;  %v887_v7 = vld [vmem:[%s2821_s3 + $0x148] sm:$0xff]  ;;  %v1755_v14 = vpack.c.bf16 %v884_v6, %v880_v4  ;;  %v912_v54 = vld [vmem:[%s2821_s3 + $0x210] sm:$0xff]  ;;  %v925_v60 = vld [vmem:[%s2821_s3 + $0x278] sm:$0xff]  ;;  %v1707_v61 = vpack.c.bf16 %v914_v53, %v910_v52 }
 0x104   :  { %v2117_v11 = vmax.f32 %v394_v9, 0.0  ;;  %v891_v8 = vld [vmem:[%s2821_s3 + $0x168] sm:$0xff]  ;;  %v889_v9 = vld [vmem:[%s2821_s3 + $0x158] sm:$0xff]  ;;  %1688 = vmatpush1.bf16.msra.mxu0 %v1687_v63  ;;  %1754 = vmatprep.subr.bf16.mxu1 %v1753_v5  ;;  %v1771_v62 = vpack.c.bf16 %v916_v56, %v912_v54  ;;  %v1709_v63 = vpack.c.bf16 %v923_v58, %v919_v57  ;;  %v1773_v3 = vpack.c.bf16 %v925_v60, %v921_v59  ;;  %v924_v4 = vld [vmem:[%s2821_s3 + $0x270] sm:$0xff] }
 0x105   :  { %v2121_v12 = vmax.f32 %v393_v10, 0.0  ;;  %v893_v10 = vld [vmem:[%s2821_s3 + $0x178] sm:$0xff]  ;;  %1690 = vmatprep.subr.bf16.mxu0 %v1689_v1  ;;  %v1693_v15 = vpack.c.bf16 %v891_v8, %v887_v7  ;;  %1756 = vmatpush1.bf16.msra.mxu1 %v1755_v14  ;;  %v922_v1 = vld [vmem:[%s2821_s3 + $0x260] sm:$0xff]  ;;  %v927_v5 = vld [vmem:[%s2821_s3 + $0x288] sm:$0xff] }
 0x106   :  { %401 = vrot.lane.b32.xlu1 %v2117_v11, %s1938_s0  ;;  %v1757_v19 = vpack.c.bf16 %v893_v10, %v889_v9  ;;  %v931_v6 = vld [vmem:[%s2821_s3 + $0x2a8] sm:$0xff]  ;;  %v929_v7 = vld [vmem:[%s2821_s3 + $0x298] sm:$0xff]  ;;  %v1711_v9 = vpack.c.bf16 %v922_v1, %v918_v0  ;;  %v1775_v10 = vpack.c.bf16 %v924_v4, %v920_v2  ;;  %v926_v14 = vld [vmem:[%s2821_s3 + $0x280] sm:$0xff] }
 0x107   :  { %v933_v8 = vld [vmem:[%s2821_s3 + $0x2b8] sm:$0xff]  ;;  %v405_v53 = vcombine.high %v2121_v12, %v1941_v42 }
 0x108   :  { %1692 = vmatpush1.bf16.msra.mxu0 %v1691_v13  ;;  %1758 = vmatprep.subr.bf16.mxu1 %v1757_v19  ;;  %v1713_v13 = vpack.c.bf16 %v931_v6, %v927_v5  ;;  %v1777_v17 = vpack.c.bf16 %v933_v8, %v929_v7  ;;  %v935_v19 = vld [vmem:[%s2821_s3 + $0x2c8] sm:$0xff] }
 0x109   :  { %1694 = vmatprep.subr.bf16.mxu0 %v1693_v15  ;;  %1760 = vmatpush1.bf16.msra.mxu1 %v1759_v26  ;;  %v930_v15 = vld [vmem:[%s2821_s3 + $0x2a0] sm:$0xff] }
 0x10a   :  { %399 = vrot.lane.b32.xlu1 %v2121_v12, %s1938_s0  ;;  %1762 = vmatprep.subr.bf16.mxu1 %v1761_v31  ;;  %v1715_v23 = vpack.c.bf16 %v930_v15, %v926_v14  ;;  %v934_v26 = vld [vmem:[%s2821_s3 + $0x2c0] sm:$0xff] }
 0x10c   :  { %1696 = vmatpush1.bf16.msra.mxu0 %v1695_v25  ;;  %v1717_v25 = vpack.c.bf16 %v939_v20, %v935_v19 }
 0x10d   :  { %1698 = vmatprep.subr.bf16.mxu0 %v1697_v27  ;;  %1764 = vmatpush1.bf16.msra.mxu1 %v1763_v38  ;;  %v938_v27 = vld [vmem:[%s2821_s3 + $0x2e0] sm:$0xff]  ;;  %v1940_v38 = vmov 1934713408  }
 0x10e   :  { %1766 = vmatprep.subr.bf16.mxu1 %v1765_v43  ;;  %v1719_v31 = vpack.c.bf16 %v938_v27, %v934_v26  ;;  %v471_v43 = vcombine.high %v2117_v11, %v1941_v42 }
 0x110   :  { %1700 = vmatpush1.bf16.msra.mxu0 %v1699_v37  ;;  %v2413_v37 = vshrl.u32 %v409_v35, 7 }
 0x111   :  { %1702 = vmatprep.subr.bf16.mxu0 %v1701_v39  ;;  %1768 = vmatpush1.bf16.msra.mxu1 %v1767_v50  ;;  %v438_v39 = vunpack.c.l.s4 %v1940_v38 }
 0x112   :  { %1770 = vmatprep.subr.bf16.mxu1 %v1769_v55  ;;  %v2416_v40 = vsub.s32 %v408_v36, %v2413_v37 }
 0x113   :  { %v439_v41 = vunpack.c.0.s8 %v438_v39  ;;  %v943_v39 = vld [vmem:[%s2821_s3 + $0x308] sm:$0xff] }
 0x114   :  { %1704 = vmatpush1.bf16.msra.mxu0 %v1703_v49  ;;  %v478_v46 = vrot.slane %v2117_v11, %v2416_v40  ;;  %v485_v49 = vrot.slane %v471_v43, %v2416_v40  ;;  %v412_v58 = vrot.slane %v2121_v12, %v2416_v40  ;;  %v419_v1 = vrot.slane %v405_v53, %v2416_v40  ;;  %v945_v43 = vld [vmem:[%s2821_s3 + $0x318] sm:$0xff] }
 0x115   :  { %1706 = vmatprep.subr.bf16.mxu0 %v1705_v51  ;;  %1772 = vmatpush1.bf16.msra.mxu1 %v1771_v62  ;;  %v2421_v45 = vsub.s32 %v439_v41, %v2413_v37  ;;  %v947_v41 = vld [vmem:[%s2821_s3 + $0x328] sm:$0xff] }
 0x116   :  { %1774 = vmatprep.subr.bf16.mxu1 %v1773_v3 }
 0x118   :  { %1708 = vmatpush1.bf16.msra.mxu0 %v1707_v61 }
 0x119   :  { %1710 = vmatprep.subr.bf16.mxu0 %v1709_v63  ;;  %1776 = vmatpush1.bf16.msra.mxu1 %v1775_v10 }
 0x11a   :  { %1778 = vmatprep.subr.bf16.mxu1 %v1777_v17 }
 0x11c   :  { %1712 = vmatpush1.bf16.msra.mxu0 %v1711_v9 }
 0x11d   :  { %1714 = vmatprep.subr.bf16.mxu0 %v1713_v13  ;;  %1780 = vmatpush1.bf16.msra.mxu1 %v1779_v24 }
 0x11e   :  { %1782 = vmatprep.subr.bf16.mxu1 %v1781_v28 }
 0x120   :  { %1716 = vmatpush1.bf16.msra.mxu0 %v1715_v23 }
 0x121   :  { %1718 = vmatprep.subr.bf16.mxu0 %v1717_v25  ;;  %1784 = vmatpush1.bf16.msra.mxu1 %v1783_v32 }
 0x124   :  { %1720 = vmatpush1.bf16.msra.mxu0 %v1719_v31 }
 0x178   :  { %v402_v44 = vpop.permute.xlu1 %401 }
 0x179   :  { %v486_v47 = vcombine.high %v402_v44, %v1941_v42  ;;  %v493_v48 = vrot.slane %v402_v44, %v2416_v40 }
 0x17b   :  { %v500_v50 = vrot.slane %v486_v47, %v2416_v40  ;;  %v501_v51 = vcombine.low %v478_v46, %v493_v48  ;;  %v502_v52 = vcombine.high %v478_v46, %v493_v48  ;;  %v1721_v48 = vpack.c.bf16 %v947_v41, %v943_v39  ;;  %v958_v39 = vld [vmem:[%s2821_s3 + $0x380] sm:$0xff] }
 0x17c   :  { %v400_v54 = vpop.permute.xlu1 %399  ;;  %v962_v41 = vld [vmem:[%s2821_s3 + $0x3a0] sm:$0xff] }
 0x17d   :  { %v509_v55 = vrot.slane %v501_v51, %v2421_v45  ;;  %v516_v56 = vrot.slane %v502_v52, %v2421_v45  ;;  %v517_v57 = vcombine.low %v485_v49, %v500_v50  ;;  %v518_v11 = vcombine.high %v485_v49, %v500_v50  ;;  %v949_v49 = vld [vmem:[%s2821_s3 + $0x338] sm:$0xff]  ;;  %v942_v50 = vld [vmem:[%s2821_s3 + $0x300] sm:$0xff]  ;;  %1722 = vmatprep.subr.bf16.mxu0 %v1721_v48  ;;  %v964_v48 = vld [vmem:[%s2821_s3 + $0x3b0] sm:$0xff] }
 0x17e   :  { %v420_v59 = vcombine.high %v400_v54, %v1941_v42  ;;  %v427_v60 = vrot.slane %v400_v54, %v2416_v40  ;;  %v946_v51 = vld [vmem:[%s2821_s3 + $0x320] sm:$0xff] }
 0x17f   :  { %v525_v61 = vrot.slane %v517_v57, %v2421_v45  ;;  %v532_v62 = vrot.slane %v518_v11, %v2421_v45  ;;  %v587_v63 = vcombine.low %v509_v55, %v516_v56  ;;  %v1406_v0 = vcombine.high %v509_v55, %v516_v56 }
 0x180   :  { %v434_v2 = vrot.slane %v420_v59, %v2416_v40  ;;  %v435_v3 = vcombine.low %v412_v58, %v427_v60  ;;  %v436_v4 = vcombine.high %v412_v58, %v427_v60  ;;  %v1785_v55 = vpack.c.bf16 %v949_v49, %v945_v43  ;;  %v967_v49 = vld [vmem:[%s2821_s3 + $0x3c8] sm:$0xff] }
 0x181   :  { %v594_v5 = vrot.slane %v587_v63, %v2416_v40  ;;  %v602_v12 = vrot.slane %v1406_v0, %v2416_v40  ;;  %v603_v6 = vcombine.low %v525_v61, %v532_v62  ;;  %v1407_v7 = vcombine.high %v525_v61, %v532_v62  ;;  %v944_v63 = vld [vmem:[%s2821_s3 + $0x310] sm:$0xff] }
 0x182   :  { %v443_v8 = vrot.slane %v435_v3, %v2421_v45  ;;  %v450_v9 = vrot.slane %v436_v4, %v2421_v45  ;;  %v451_v10 = vcombine.low %v419_v1, %v434_v2  ;;  %v452_v13 = vcombine.high %v419_v1, %v434_v2  ;;  %1786 = vmatprep.subr.bf16.mxu1 %v1785_v55  ;;  %v948_v0 = vld [vmem:[%s2821_s3 + $0x330] sm:$0xff]  ;;  %v951_v4 = vld [vmem:[%s2821_s3 + $0x348] sm:$0xff]  ;;  %v973_v55 = vld [vmem:[%s2821_s3 + $0x3f8] sm:$0xff] }
 0x183   :  { %v610_v14 = vrot.slane %v603_v6, %v2416_v40  ;;  %v618_v15 = vrot.slane %v1407_v7, %v2416_v40  ;;  %v619_v16 = vcombine.low %v594_v5, %v602_v12  ;;  %v1723_v58 = vpack.c.bf16 %v946_v51, %v942_v50  ;;  %v955_v5 = vld [vmem:[%s2821_s3 + $0x368] sm:$0xff]  ;;  %v953_v7 = vld [vmem:[%s2821_s3 + $0x358] sm:$0xff] }
 0x184   :  { %v459_v17 = vrot.slane %v451_v10, %v2421_v45  ;;  %v466_v18 = vrot.slane %v452_v13, %v2421_v45  ;;  %v537_v19 = vcombine.low %v443_v8, %v450_v9  ;;  %v1404_v20 = vcombine.high %v443_v8, %v450_v9  ;;  %v957_v8 = vld [vmem:[%s2821_s3 + $0x378] sm:$0xff]  ;;  %v950_v9 = vld [vmem:[%s2821_s3 + $0x340] sm:$0xff] }
 0x185   :  { %v627_v21 = vcombine.low %v610_v14, %v618_v15  ;;  %v626_v26 = vrot.slane %v619_v16, %v2421_v45  ;;  %1724 = vmatpush1.bf16.msra.mxu0 %v1723_v58  ;;  %v1787_v15 = vpack.c.bf16 %v948_v0, %v944_v63  ;;  %v954_v16 = vld [vmem:[%s2821_s3 + $0x360] sm:$0xff]  ;;  %v972_v0 = vld [vmem:[%s2821_s3 + $0x3f0] sm:$0xff] }
 0x186   :  { %v544_v22 = vrot.slane %v537_v19, %v2416_v40  ;;  %v552_v23 = vrot.slane %v1404_v20, %v2416_v40  ;;  %v553_v24 = vcombine.low %v459_v17, %v466_v18  ;;  %v1405_v25 = vcombine.high %v459_v17, %v466_v18  ;;  %v952_v17 = vld [vmem:[%s2821_s3 + $0x350] sm:$0xff]  ;;  %v966_v58 = vld [vmem:[%s2821_s3 + $0x3c0] sm:$0xff] }
 0x187   :  { %v634_v27 = vrot.slane %v627_v21, %v2421_v45  ;;  %v956_v18 = vld [vmem:[%s2821_s3 + $0x370] sm:$0xff]  ;;  %1788 = vmatpush1.bf16.msra.mxu1 %v1787_v15  ;;  %v970_v63 = vld [vmem:[%s2821_s3 + $0x3e0] sm:$0xff] }
 0x188   :  { %v560_v28 = vrot.slane %v553_v24, %v2416_v40  ;;  %v568_v29 = vrot.slane %v1405_v25, %v2416_v40  ;;  %v569_v30 = vcombine.low %v544_v22, %v552_v23 }
 0x189   :  { %v635_v31 = vcombine.low %v626_v26, %v634_v27  ;;  %v636_v32 = vcombine.high %v626_v26, %v634_v27  ;;  %v1409_v33 = vcombine.high %v634_v27, %v1941_v42  ;;  %v959_v26 = vld [vmem:[%s2821_s3 + $0x388] sm:$0xff] }
 0x18a   :  { %v577_v34 = vcombine.low %v560_v28, %v568_v29  ;;  %v576_v44 = vrot.slane %v569_v30, %v2421_v45  ;;  %v963_v27 = vld [vmem:[%s2821_s3 + $0x3a8] sm:$0xff]  ;;  %v1725_v28 = vpack.c.bf16 %v955_v5, %v951_v4  ;;  %v1789_v29 = vpack.c.bf16 %v957_v8, %v953_v7  ;;  %v1190_v7 = vld [vmem:[%s2823_s5 + $0x180] sm:$0xff] }
 0x18b   :  { %v710_v35 = vrot.slane %v635_v31, %v2416_v40  ;;  %v725_v36 = vrot.slane %v636_v32, %v2416_v40  ;;  %v703_v38 = vcombine.high %v635_v31, %v1941_v42  ;;  %v732_v47 = vrot.slane %v1409_v33, %v2416_v40  ;;  %v961_v32 = vld [vmem:[%s2821_s3 + $0x398] sm:$0xff] }
 0x18c   :  { %v584_v46 = vrot.slane %v577_v34, %v2421_v45  ;;  %v1727_v30 = vpack.c.bf16 %v954_v16, %v950_v9  ;;  %v1791_v31 = vpack.c.bf16 %v956_v18, %v952_v17  ;;  %1726 = vmatprep.subr.bf16.mxu0 %v1725_v28  ;;  %1790 = vmatprep.subr.bf16.mxu1 %v1789_v29  ;;  %v1191_v9 = vld [vmem:[%s2823_s5 + $0x188] sm:$0xff] }
 0x18d   :  { %v734_v52 = vcombine.high %v710_v35, %v725_v36  ;;  %v733_v53 = vcombine.low %v710_v35, %v725_v36  ;;  %v717_v54 = vrot.slane %v703_v38, %v2416_v40  ;;  %v965_v38 = vld [vmem:[%s2821_s3 + $0x3b8] sm:$0xff]  ;;  %v1735_v4 = vpack.c.bf16 %v970_v63, %v966_v58  ;;  %v1176_v63 = vld [vmem:[%s2823_s5 + $0x110] sm:$0xff] }
 0x18e   :  { %v585_v56 = vcombine.low %v576_v44, %v584_v46  ;;  %v586_v57 = vcombine.high %v576_v44, %v584_v46  ;;  %v1408_v11 = vcombine.high %v584_v46, %v1941_v42  ;;  %v1729_v46 = vpack.c.bf16 %v963_v27, %v959_v26  ;;  %1728 = vmatpush1.bf16.msra.mxu0 %v1727_v30 }
 0x18f   :  { %v748_v59 = vrot.slane %v734_v52, %v2421_v45  ;;  %v2484_v60 = vrot.slane %v733_v53, %v2421_v45  ;;  %v749_v61 = vcombine.low %v717_v54, %v732_v47  ;;  %v750_v62 = vcombine.high %v717_v54, %v732_v47  ;;  %v960_v47 = vld [vmem:[%s2821_s3 + $0x390] sm:$0xff]  ;;  %v971_v53 = vld [vmem:[%s2821_s3 + $0x3e8] sm:$0xff]  ;;  %v969_v54 = vld [vmem:[%s2821_s3 + $0x3d8] sm:$0xff]  ;;  %1792 = vmatpush1.bf16.msra.mxu1 %v1791_v31 }
 0x190   :  { %v644_v1 = vrot.slane %v585_v56, %v2416_v40  ;;  %v659_v2 = vrot.slane %v586_v57, %v2416_v40  ;;  %v637_v3 = vcombine.high %v585_v56, %v1941_v42  ;;  %v666_v12 = vrot.slane %v1408_v11, %v2416_v40  ;;  %1730 = vmatprep.subr.bf16.mxu0 %v1729_v46 }
 0x191   :  { %v2503_v6 = vrot.slane %v749_v61, %v2421_v45  ;;  %v765_v19 = vcombine.high %v2484_v60, %v1941_v42  ;;  %v2527_v20 = vcombine.high %v748_v59, %v1941_v42  ;;  %v1793_v11 = vpack.c.bf16 %v965_v38, %v961_v32 }
 0x192   :  { %v668_v10 = vcombine.high %v644_v1, %v659_v2  ;;  %v667_v13 = vcombine.low %v644_v1, %v659_v2  ;;  %v651_v14 = vrot.slane %v637_v3, %v2416_v40  ;;  %v2530_v40 = vrot.slane %v750_v62, %v2421_v45 }
 0x193   :  { %v2534_v21 = vcombine.high %v2503_v6, %v1941_v42  ;;  %v1731_v61 = vpack.c.bf16 %v962_v41, %v958_v39  ;;  %v1795_v62 = vpack.c.bf16 %v964_v48, %v960_v47  ;;  %1794 = vmatprep.subr.bf16.mxu1 %v1793_v11  ;;  %v1733_v2 = vpack.c.bf16 %v971_v53, %v967_v49  ;;  %v1174_v41 = vld [vmem:[%s2823_s5 + $0x100] sm:$0xff]  ;;  %v1161_v49 = vld [vmem:[%s2823_s5 + $0x98] sm:$0xff] }
 0x194   :  { %v682_v22 = vrot.slane %v668_v10, %v2421_v45  ;;  %v2538_v23 = vrot.slane %v667_v13, %v2421_v45  ;;  %v683_v24 = vcombine.low %v651_v14, %v666_v12  ;;  %v684_v25 = vcombine.high %v651_v14, %v666_v12  ;;  %v1158_v12 = vld [vmem:[%s2823_s5 + $0x80] sm:$0xff]  ;;  %v1145_v11 = vld [vmem:[%s2823_s5 + $0x18] sm:$0xff] }
 0x195   :  { %v768_v44 = vcombine.high %v2530_v40, %v1941_v42  ;;  %v1797_v3 = vpack.c.bf16 %v973_v55, %v969_v54  ;;  %1732 = vmatpush1.bf16.msra.mxu0 %v1731_v61  ;;  %1796 = vmatpush1.bf16.msra.mxu1 %v1795_v62  ;;  %v1833_v10 = vpack.c.bf16 %v1191_v9, %v1190_v7  ;;  %v1178_v9 = vld [vmem:[%s2823_s5 + $0x120] sm:$0xff] }
 0x196   :  { %v1878_v33 = vpack.i.bf16 %v682_v22, %v748_v59  ;;  %v699_v34 = vcombine.high %v2538_v23, %v1941_v42  ;;  %v691_v35 = vrot.slane %v683_v24, %v2421_v45  ;;  %v700_v36 = vcombine.high %v682_v22, %v1941_v42  ;;  %1734 = vmatprep.subr.bf16.mxu0 %v1733_v2  ;;  %v1194_v2 = vld [vmem:[%s2823_s5 + $0x1a0] sm:$0xff] }
 0x197   :  { %v698_v43 = vrot.slane %v684_v25, %v2421_v45  ;;  %1798 = vmatprep.subr.bf16.mxu1 %v1797_v3  ;;  %v1195_v3 = vld [vmem:[%s2823_s5 + $0x1a8] sm:$0xff] }
 0x198   :  { %1879 = vrot.lane.b32.xlu1 %v1878_v33, %s1942_s25  ;;  %v1883_v45 = vpack.i.bf16 %v699_v34, %v765_v19  ;;  %v1893_v50 = vpack.i.bf16 %v691_v35, %v2503_v6  ;;  %v1888_v51 = vpack.i.bf16 %v700_v36, %v2527_v20  ;;  %v701_v52 = vcombine.high %v691_v35, %v1941_v42  ;;  %v1159_v6 = vld [vmem:[%s2823_s5 + $0x88] sm:$0xff]  ;;  %s1946_s25 = smov 96   ;;  %v1142_v35 = vld [vmem:[%s2823_s5] sm:$0xff] }
 0x199   :  { %v1903_v56 = vpack.i.bf16 %v698_v43, %v2530_v40  ;;  %v702_v57 = vcombine.high %v698_v43, %v1941_v42  ;;  %v968_v42 = vld [vmem:[%s2821_s3 + $0x3d0] sm:$0xff]  ;;  %v1801_v8 = vpack.c.bf16 %v1159_v6, %v1158_v12  ;;  %1736 = vmatpush1.bf16.msra.mxu0 %v1735_v4  ;;  %v1143_v36 = vld [vmem:[%s2823_s5 + $0x8] sm:$0xff]  ;;  %v1146_v12 = vld [vmem:[%s2823_s5 + $0x20] sm:$0xff] }
 0x19a   :  { %1884 = vrot.lane.b32.xlu0 %v1883_v45, %s1943_s10  ;;  %v1898_v59 = vpack.i.bf16 %v701_v52, %v2534_v21  ;;  %v1799_v5 = vpack.c.bf16 %v972_v0, %v968_v42  ;;  %v1175_v43 = vld [vmem:[%s2823_s5 + $0x108] sm:$0xff]  ;;  %v1192_v45 = vld [vmem:[%s2823_s5 + $0x190] sm:$0xff]  ;;  %v1803_v55 = vpack.c.bf16 %v1143_v36, %v1142_v35  ;;  %v1177_v42 = vld [vmem:[%s2823_s5 + $0x118] sm:$0xff] }
 0x19b   :  { %v1908_v1 = vpack.i.bf16 %v702_v57, %v768_v44  ;;  %1802 = vmatprep.subr.bf16.mxu0 %v1801_v8  ;;  %v1160_v44 = vld [vmem:[%s2823_s5 + $0x90] sm:$0xff]  ;;  %v1162_v0 = vld [vmem:[%s2823_s5 + $0xa0] sm:$0xff]  ;;  %v1147_v6 = vld [vmem:[%s2823_s5 + $0x28] sm:$0xff]  ;;  %v1841_v8 = vpack.c.bf16 %v1195_v3, %v1194_v2 }
 0x19c   :  { %1894 = vrot.lane.b32.xlu1 %v1893_v50, %s1944_s16  ;;  %1800 = vmatpush1.bf16.msra.mxu1 %v1799_v5  ;;  %v1193_v50 = vld [vmem:[%s2823_s5 + $0x198] sm:$0xff]  ;;  %v1144_v57 = vld [vmem:[%s2823_s5 + $0x10] sm:$0xff]  ;;  %v1805_v61 = vpack.c.bf16 %v1161_v49, %v1160_v44  ;;  %v1839_v5 = vpack.c.bf16 %v1177_v42, %v1176_v63  ;;  %s1361_s16 = sshll.u32 %s1948_s1, 4  ;;  %s1362_s16 = int_to_ptr.vmem [resolvable:$true] %s1361_s16 }
 0x19d   :  { %1834 = vmatprep.subr.bf16.mxu1 %v1833_v10  ;;  %v1837_v62 = vpack.c.bf16 %v1193_v50, %v1192_v45  ;;  %v1807_v4 = vpack.c.bf16 %v1145_v11, %v1144_v57  ;;  %v1179_v10 = vld [vmem:[%s2823_s5 + $0x128] sm:$0xff]  ;;  %v1168_v35 = vld [vmem:[%s2823_s5 + $0xd0] sm:$0xff]  ;;  %v1169_v36 = vld [vmem:[%s2823_s5 + $0xd8] sm:$0xff]  ;;  %s1913_s17 = scalar_lea.vmem %s1362_s16, 32  ;;  %p1918_p1 = scmp.lt.s32.totalorder %s1362_s16, %s1362_s16 }
 0x19e   :  { %1889 = vrot.lane.b32.xlu0 %v1888_v51, %s1945_s22  ;;  %v1152_v44 = vld [vmem:[%s2823_s5 + $0x50] sm:$0xff]  ;;  %v1185_v45 = vld [vmem:[%s2823_s5 + $0x158] sm:$0xff]  ;;  %v1170_v50 = vld [vmem:[%s2823_s5 + $0xe0] sm:$0xff]  ;;  %p1914_p0 = scmp.ne.s32.totalorder %s1362_s16, %s1913_s17  ;;  %p1919_p2 = scmp.lt.s32.totalorder %s1913_s17, %s1913_s17 }
 0x19f   :  { %v1184_v49 = vld [vmem:[%s2823_s5 + $0x150] sm:$0xff]  ;;  %v1154_v11 = vld [vmem:[%s2823_s5 + $0x60] sm:$0xff]  ;;  %v1205_v3 = vld [vmem:[%s2823_s5 + $0x1f8] sm:$0xff] }
 0x1a0   :  { %1904 = vrot.lane.b32.xlu1 %v1903_v56, %s1946_s25  ;;  %v1835_v56 = vpack.c.bf16 %v1175_v43, %v1174_v41  ;;  %v1172_v42 = vld [vmem:[%s2823_s5 + $0xf0] sm:$0xff]  ;;  %p1920_p3 = por %p1919_p2, %p1918_p1 }
 0x1a2   :  { %1899 = vrot.lane.b32.xlu0 %v1898_v59, %s1947_s26  ;;  %p1921_p4 = pnand %p1920_p3, %p1914_p0 }
 0x1a6   :  { %1909 = vrot.lane.b32.xlu0 %v1908_v1, %s1938_s0  ;;  %v1163_v1 = vld [vmem:[%s2823_s5 + $0xa8] sm:$0xff] }
 0x1a7   :  { %v1809_v7 = vpack.c.bf16 %v1163_v1, %v1162_v0  ;;  %v1173_v0 = vld [vmem:[%s2823_s5 + $0xf8] sm:$0xff]  ;;  %v1204_v1 = vld [vmem:[%s2823_s5 + $0x1f0] sm:$0xff] }
 0x1a8   :  { %v1829_v2 = vpack.c.bf16 %v1173_v0, %v1172_v42 }
 0x20a   :  { %v1880_v13 = vpop.permute.xlu1 %1879 }
 0x20b   :  { %v1882_v20 = vunpack.i.h.bf16 %v1880_v13  ;;  %v1881_v40 = vunpack.i.l.bf16 %v1880_v13  ;;  %v1164_v13 = vld [vmem:[%s2823_s5 + $0xb0] sm:$0xff] }
 0x20c   :  { %v1885_v14 = vpop.permute.xlu0 %1884 }
 0x20d   :  { %v1887_v15 = vunpack.i.h.bf16 %v1885_v14  ;;  %v1886_v16 = vunpack.i.l.bf16 %v1885_v14  ;;  %v1165_v14 = vld [vmem:[%s2823_s5 + $0xb8] sm:$0xff] }
 0x20e   :  { %v1895_v19 = vpop.permute.xlu1 %1894 }
 0x20f   :  { %v826_v17 = vsel %vm825_vm1, %v2538_v23, %v1887_v15  ;;  %v839_v18 = vsel %vm825_vm1, %v2484_v60, %v1886_v16  ;;  %v1897_v29 = vunpack.i.h.bf16 %v1895_v19  ;;  %v1896_v30 = vunpack.i.l.bf16 %v1895_v19  ;;  %v1196_v15 = vld [vmem:[%s2823_s5 + $0x1b0] sm:$0xff]  ;;  %v1197_v16 = vld [vmem:[%s2823_s5 + $0x1b8] sm:$0xff] }
 0x210   :  { %v1890_v21 = vpop.permute.xlu0 %1889  ;;  %v828_v25 = vsel %vm827_vm2, %v826_v17, %v1882_v20  ;;  %v840_v26 = vsel %vm827_vm2, %v839_v18, %v1881_v40  ;;  %v1811_v17 = vpack.c.bf16 %v1147_v6, %v1146_v12  ;;  %v1843_v18 = vpack.c.bf16 %v1179_v10, %v1178_v9  ;;  %v1148_v19 = vld [vmem:[%s2823_s5 + $0x30] sm:$0xff]  ;;  %v1149_v20 = vld [vmem:[%s2823_s5 + $0x38] sm:$0xff] }
 0x211   :  { %v1892_v22 = vunpack.i.h.bf16 %v1890_v21  ;;  %v1891_v24 = vunpack.i.l.bf16 %v1890_v21  ;;  %v1813_v40 = vpack.c.bf16 %v1165_v14, %v1164_v13  ;;  %v1845_v21 = vpack.c.bf16 %v1197_v16, %v1196_v15  ;;  %v974_v14 = vld [vmem:[%s2822_s4] sm:$0xf] }
 0x212   :  { %v1905_v23 = vpop.permute.xlu1 %1904  ;;  %v1861_v12 = vpack.c.bf16 %v1205_v3, %v1204_v1  ;;  %v978_v10 = vsub.s32 0, %v2413_v37  ;;  %v986_v13 = vsub.s32 2, %v2413_v37  ;;  %v982_v15 = vsub.s32 1, %v2413_v37 }
 0x213   :  { %v830_v27 = vsel %vm829_vm3, %v828_v25, %v1892_v22  ;;  %v841_v28 = vsel %vm829_vm3, %v840_v26, %v1891_v24  ;;  %v1907_v46 = vunpack.i.h.bf16 %v1905_v23  ;;  %v1906_v47 = vunpack.i.l.bf16 %v1905_v23  ;;  %v1180_v22 = vld [vmem:[%s2823_s5 + $0x130] sm:$0xff]  ;;  %v1181_v24 = vld [vmem:[%s2823_s5 + $0x138] sm:$0xff]  ;;  %v1166_v25 = vld [vmem:[%s2823_s5 + $0xc0] sm:$0xff] }
 0x214   :  { %v1900_v31 = vpop.permute.xlu0 %1899  ;;  %v832_v33 = vsel %vm831_vm4, %v830_v27, %v1897_v29  ;;  %v842_v34 = vsel %vm831_vm4, %v841_v28, %v1896_v30  ;;  %v1167_v26 = vld [vmem:[%s2823_s5 + $0xc8] sm:$0xff]  ;;  %v1198_v27 = vld [vmem:[%s2823_s5 + $0x1c0] sm:$0xff]  ;;  %v1815_v29 = vpack.c.bf16 %v1149_v20, %v1148_v19  ;;  %v1847_v30 = vpack.c.bf16 %v1181_v24, %v1180_v22 }
 0x215   :  { %v1902_v32 = vunpack.i.h.bf16 %v1900_v31  ;;  %v1901_v60 = vunpack.i.l.bf16 %v1900_v31  ;;  %v1199_v28 = vld [vmem:[%s2823_s5 + $0x1c8] sm:$0xff]  ;;  %v1150_v31 = vld [vmem:[%s2823_s5 + $0x40] sm:$0xff]  ;;  %v990_v16 = vsub.s32 3, %v2413_v37  ;;  %v983_v19 = vrot.slane %v974_v14, %v982_v15 }
 0x216   :  { %v1151_v23 = vld [vmem:[%s2823_s5 + $0x48] sm:$0xff] }
 0x217   :  { %v834_v38 = vsel %vm833_vm5, %v832_v33, %v1902_v32  ;;  %v843_v39 = vsel %vm833_vm5, %v842_v34, %v1901_v60  ;;  %v1817_v32 = vpack.c.bf16 %v1167_v26, %v1166_v25  ;;  %v1849_v60 = vpack.c.bf16 %v1199_v28, %v1198_v27  ;;  %v1182_v33 = vld [vmem:[%s2823_s5 + $0x140] sm:$0xff]  ;;  %v1183_v34 = vld [vmem:[%s2823_s5 + $0x148] sm:$0xff] }
 0x218   :  { %v1910_v48 = vpop.permute.xlu0 %1909  ;;  %v844_v53 = vsel %vm835_vm6, %v843_v39, %v1906_v47  ;;  %v836_v54 = vsel %vm835_vm6, %v834_v38, %v1907_v46  ;;  %v1200_v38 = vld [vmem:[%s2823_s5 + $0x1d0] sm:$0xff]  ;;  %v1201_v39 = vld [vmem:[%s2823_s5 + $0x1d8] sm:$0xff]  ;;  %v1819_v41 = vpack.c.bf16 %v1151_v23, %v1150_v31  ;;  %v1851_v43 = vpack.c.bf16 %v1183_v34, %v1182_v33 }
 0x219   :  { %v1912_v51 = vunpack.i.h.bf16 %v1910_v48  ;;  %v1911_v52 = vunpack.i.l.bf16 %v1910_v48  ;;  %v1153_v46 = vld [vmem:[%s2823_s5 + $0x58] sm:$0xff]  ;;  %v1821_v47 = vpack.c.bf16 %v1169_v36, %v1168_v35  ;;  %v1853_v48 = vpack.c.bf16 %v1201_v39, %v1200_v38 }
 0x21a   :  { %v991_v20 = vrot.slane %v974_v14, %v990_v16 }
 0x21b   :  { %v845_v58 = vsel %vm837_vm7, %v844_v53, %v1911_v52  ;;  %v838_v59 = vsel %vm837_vm7, %v836_v54, %v1912_v51  ;;  %v1171_v51 = vld [vmem:[%s2823_s5 + $0xe8] sm:$0xff]  ;;  %v1202_v52 = vld [vmem:[%s2823_s5 + $0x1e0] sm:$0xff]  ;;  %v1823_v54 = vpack.c.bf16 %v1153_v46, %v1152_v44 }
 0x21c   :  { %1060 = vmatprep.mubr.f32.mxu0 %v845_v58  ;;  %1131 = vmatprep.mubr.f32.mxu1 %v845_v58  ;;  %v1203_v53 = vld [vmem:[%s2823_s5 + $0x1e8] sm:$0xff] }
 0x21d   :  { %1061 = vmatmul.mubr.f32.vlgmr.msra.gmra.mrb[4].mxu0 %v838_v59  ;;  %1132 = vmatmul.mubr.f32.vlgmr.msra.gmra.mrb[4].mxu1 %v838_v59  ;;  %v1857_v57 = vpack.c.bf16 %v1203_v53, %v1202_v52  ;;  %v1155_v58 = vld [vmem:[%s2823_s5 + $0x68] sm:$0xff]  ;;  %v1186_v59 = vld [vmem:[%s2823_s5 + $0x160] sm:$0xff] }
 0x21e   :  { %1804 = vmatpush3.bf16.msra.mxu0 %v1803_v55  ;;  %1836 = vmatpush3.bf16.msra.mxu1 %v1835_v56  ;;  %v1855_v55 = vpack.c.bf16 %v1185_v45, %v1184_v49  ;;  %v1825_v56 = vpack.c.bf16 %v1171_v51, %v1170_v50 }
 0x21f   :  { %1806 = vmatprep.subr.bf16.mxu0 %v1805_v61  ;;  %1838 = vmatprep.subr.bf16.mxu1 %v1837_v62  ;;  %v1827_v61 = vpack.c.bf16 %v1155_v58, %v1154_v11  ;;  %v1187_v62 = vld [vmem:[%s2823_s5 + $0x168] sm:$0xff] }
 0x220   :  { %v1859_v63 = vpack.c.bf16 %v1187_v62, %v1186_v59 }
 0x222   :  { %1808 = vmatpush3.bf16.msra.mxu0 %v1807_v4  ;;  %1840 = vmatpush3.bf16.msra.mxu1 %v1839_v5  ;;  %v1156_v4 = vld [vmem:[%s2823_s5 + $0x70] sm:$0xff]  ;;  %v1157_v5 = vld [vmem:[%s2823_s5 + $0x78] sm:$0xff] }
 0x223   :  { %1810 = vmatprep.subr.bf16.mxu0 %v1809_v7  ;;  %1842 = vmatprep.subr.bf16.mxu1 %v1841_v8  ;;  %v1831_v6 = vpack.c.bf16 %v1157_v5, %v1156_v4  ;;  %v1188_v7 = vld [vmem:[%s2823_s5 + $0x170] sm:$0xff]  ;;  %v1189_v8 = vld [vmem:[%s2823_s5 + $0x178] sm:$0xff] }
 0x224   :  { %v1863_v9 = vpack.c.bf16 %v1189_v8, %v1188_v7 }
 0x226   :  { %1812 = vmatpush3.bf16.msra.mxu0 %v1811_v17  ;;  %1844 = vmatpush3.bf16.msra.mxu1 %v1843_v18  ;;  %v979_v17 = vrot.slane %v974_v14, %v978_v10  ;;  %v987_v18 = vrot.slane %v974_v14, %v986_v13 }
 0x227   :  { %1814 = vmatprep.subr.bf16.mxu0 %v1813_v40  ;;  %1846 = vmatprep.subr.bf16.mxu1 %v1845_v21 }
 0x22a   :  { %1816 = vmatpush3.bf16.msra.mxu0 %v1815_v29  ;;  %1848 = vmatpush3.bf16.msra.mxu1 %v1847_v30 }
 0x22b   :  { %1818 = vmatprep.subr.bf16.mxu0 %v1817_v32  ;;  %1850 = vmatprep.subr.bf16.mxu1 %v1849_v60  ;;  %v1410_v60 = vld [vmem:[%s2824_s6] ss:$0 sm:$0xff] }
 0x22e   :  { %1820 = vmatpush3.bf16.msra.mxu0 %v1819_v41  ;;  %1852 = vmatpush3.bf16.msra.mxu1 %v1851_v43 }
 0x22f   :  { %1822 = vmatprep.subr.bf16.mxu0 %v1821_v47  ;;  %1854 = vmatprep.subr.bf16.mxu1 %v1853_v48 }
 0x232   :  { %1824 = vmatpush3.bf16.msra.mxu0 %v1823_v54  ;;  %1856 = vmatpush3.bf16.msra.mxu1 %v1855_v55 }
 0x233   :  { %1826 = vmatprep.subr.bf16.mxu0 %v1825_v56  ;;  %1858 = vmatprep.subr.bf16.mxu1 %v1857_v57 }
 0x236   :  { %1828 = vmatpush3.bf16.msra.mxu0 %v1827_v61  ;;  %1860 = vmatpush3.bf16.msra.mxu1 %v1859_v63 }
 0x237   :  { %1830 = vmatprep.subr.bf16.mxu0 %v1829_v2  ;;  %1862 = vmatprep.subr.bf16.mxu1 %v1861_v12 }
 0x23a   :  { %1832 = vmatpush3.bf16.msra.mxu0 %v1831_v6  ;;  %1864 = vmatpush3.bf16.msra.mxu1 %v1863_v9 }
 0x2f0   :  { %v1062_v40 = vpop.f32.mrb[4].mxu0  ;;  %v1133_v21 = vpop.f32.mrb[4].mxu1 }
 0x2f1   :  { %v1063_v22 = vadd.f32 %v1062_v40, %v979_v17  ;;  %v1134_v24 = vadd.f32 %v1133_v21, %v987_v18  ;;  %v1064_v25 = vpop.f32.mrb[5].mxu0  ;;  %v1135_v26 = vpop.f32.mrb[5].mxu1 }
 0x2f2   :  { %v1065_v27 = vadd.f32 %v1064_v25, %v983_v19  ;;  %v1136_v28 = vadd.f32 %v1135_v26, %v991_v20 }
 0x2f3   :  { %v1138_v31 = vmax.f32 %v1063_v22, 0.0  ;;  %v1140_v23 = vmax.f32 %v1134_v24, 0.0 }
 0x2f4   :  { %v1139_v29 = vmax.f32 %v1065_v27, 0.0  ;;  %v1141_v30 = vmax.f32 %v1136_v28, 0.0 }
 0x2f6   :  { %1277 = vmatprep.mubr.f32.mxu0 %v1139_v29  ;;  %1347 = vmatprep.mubr.f32.mxu1 %v1141_v30 }
 0x2f7   :  { %1278 = vmatmul.mubr.f32.vlgmr.msra.gmra.mrb[6].mxu0 %v1138_v31  ;;  %1348 = vmatmul.mubr.f32.vlgmr.msra.gmra.mrb[6].mxu1 %v1140_v23 }
 0x3ca   :  { %v1487_v37 = vpop.f32.mrb[6].mxu0  ;;  %v1522_v32 = vpop.f32.mrb[6].mxu1 }
 0x3cb   :  { %v1488_v33 = vpop.f32.mrb[7].mxu0  ;;  %v1523_v34 = vpop.f32.mrb[7].mxu1 }
 0x3cc   :  { %v1489_v35 = vadd.f32 %v1488_v33, %v1487_v37  ;;  %v1524_v36 = vadd.f32 %v1523_v34, %v1522_v32 }
 0x3ce   :  { %v1280_v38 = vadd.f32 %v1489_v35, %v1410_v60 }
 0x3d0   :  { %v1350_v39 = vadd.f32 %v1524_v36, %v1280_v38 }
 0x3d2   :  { %1354 = vst.msk [vmem:[#allocation2] sm:$0x3] %vm1353_vm8, %v1350_v39 }
 0x3d3   :  { %1924 = shalt.err (!%p1921_p4)
}
 0x3d4   :  { %s1925_s19 = scalar_lea.hbm %s2825_s7, 32 }
 0x3d5   :  { %p1926_p5 = scmp.ne.s32.totalorder %s2825_s7, %s1925_s19  ;;  %p1929_p6 = scmp.lt.u32.totalorder %s1925_s19, %s2825_s7 }
 0x3d7   :  { %p1931_p7 = pnand %p1929_p6, %p1926_p5 }
 0x3d9   :  { %1934 = shalt.err (!%p1931_p7)
}
 0x3da   :  { %1364 = dma.vmem_to_hbm [thread:$0]  %s1362_s16, 32, %s2825_s7, [#allocation3]  }
 0x3db   :  { %1935 = dma.done.wait [#allocation3], 32  }
 0x3dc   :  { %1936 = vsyncadd [#allocation3], 4294967264 }
 0x3dd   :  { %1368 = vsyncpa [#allocation3], 1 }

</bundles_post_ra>
